<compile_context>
chip_gen: v5e
topology: v5e:2x2
jax: 0.10.0
libtpu: 0.0.40
codegen_flags: <defaults>
</compile_context>

<pallas_src>
import jax
import jax.numpy as jnp
from jax.experimental import pallas as pl
from jax.experimental.pallas import tpu as pltpu

SQRT_HALF = 0.7071067811865476

# ----------------------------------------------------------------------------
# packed-operand layout (static offsets shared by fold_params and the kernel)
# ----------------------------------------------------------------------------
# bf16 weight slab (W_ROWS, 192); row starts aligned to the bf16 (16,128) tile:
#   rows   0:192  lanes   0:48   W1     patch-rearrange∘patch-embed∘reduce-conv∘BN
#   rows   0:192  lanes 128:148  WHEAD  cf-conv2∘NCHW-flatten∘linear1
#   rows 192:240  lanes   0:48   W2     Haar-DWT∘3x3-conv∘BN
#   rows 192:240  lanes 128:140  W3     kv_embed (2x2 / stride-2 conv)
#   rows 240:252  lanes   0:192  W4     kv v-half∘proj∘token-broadcast∘rearrange
#   rows 256:304  lanes   0:192  W5     IDWT∘proj idwt-part∘rearrange
#   rows 304:324  lanes   0:2    W2C    linear2
W_ROWS = 324

# f32 bias/scale slab (B_ROWS, 192) rows:
R_B1, R_B2, R_B3, R_GKV, R_BKV, R_B4, R_GCF, R_BCF, R_BH, R_B2C, R_SC = range(11)
B_ROWS = 11
# lane offsets inside the scalar row R_SC:
S_BGR, S_BLR = 0, 1          # global_reduce / local_reduce biases
S_WCS, S_BCS = 2, 5          # channel_select weight (3) / bias (3)
S_WSS_L, S_WSS_G, S_BSS = 8, 9, 10   # spatial_select weights / bias
S_WGR, S_WLR = 11, 14        # global_reduce (÷64 folded) / local_reduce weights (3 each)
S_GLN, S_BLN = 17, 20        # BiAttn LayerNorm(3) gamma / beta
S_A6, S_BPRE = 24, 42        # catConv∘cf-conv 3x6 channel mix (18) + its bias (3)


# ----------------------------------------------------------------------------
# in-kernel math helpers (Mosaic-supported elementwise ops only, all f32)
# ----------------------------------------------------------------------------
def _erf(x):
    # Abramowitz & Stegun 7.1.26, |err| < 1.5e-7, for exact-GELU (erf form).
    ax = jnp.abs(x)
    t = 1.0 / (1.0 + 0.3275911 * ax)
    poly = t * (0.254829592 + t * (-0.284496736 + t * (1.421413741
               + t * (-1.453152027 + t * 1.061405429))))
    y = 1.0 - poly * jnp.exp(-ax * ax)
    return jnp.where(x >= 0.0, y, -y)


def _gelu(x):  # matches nn.GELU() (erf formulation) to ~f32 precision
    return 0.5 * x * (1.0 + _erf(x * SQRT_HALF))


def _sigmoid(x):
    return 1.0 / (1.0 + jnp.exp(-x))


def _mxu(a, w_bf16):
    # bf16 MXU operands, f32 accumulation; elementwise consumers stay f32.
    return jnp.dot(a.astype(jnp.bfloat16), w_bf16, preferred_element_type=jnp.float32)


# ----------------------------------------------------------------------------
# The fused kernel: whole WBANet forward for one batch block per grid step.
# Activations are per-sample rows; flat index of an 8x8x3 image is NCHW
# (c*64 + h*8 + w), so x[:, c*64:(c+1)*64] is channel c's 64 positions.
# ----------------------------------------------------------------------------
def wbanet_kernel(x_ref, w_ref, b_ref, o_ref):
    def row(r, w):                        # (1, w) bias/scale vector
        return b_ref[r:r + 1, 0:w]

    def sc(k):                            # (1, 1) scalar from the scalar row
        return b_ref[R_SC:R_SC + 1, k:k + 1]

    x0 = x_ref[...]                                               # (BB, 192) f32

    # ---- WSM / WaveAttention path (folded affine chain) ----------------------
    red = jnp.maximum(_mxu(x0, w_ref[0:192, 0:48]) + row(R_B1, 48), 0.0)        # (BB,48)
    filt = jnp.maximum(_mxu(red, w_ref[192:240, 0:48]) + row(R_B2, 48), 0.0)    # (BB,48)
    filtb = filt.astype(jnp.bfloat16)
    # IDWT half of the WSM output (independent of the kv LayerNorm) hoisted early
    wsm_idwt = jnp.dot(filtb, w_ref[256:304, 0:192],
                       preferred_element_type=jnp.float32)                      # (BB,192)
    kvin = jnp.dot(filtb, w_ref[192:240, 128:140],
                   preferred_element_type=jnp.float32) + row(R_B3, 12)          # (BB,12)
    mu = jnp.mean(kvin, axis=-1, keepdims=True)
    var = jnp.mean((kvin - mu) ** 2, axis=-1, keepdims=True)
    kvn = (kvin - mu) * jax.lax.rsqrt(var + 1e-5) * row(R_GKV, 12) + row(R_BKV, 12)
    # attention over the single kv token is identically 1 => output = v broadcast
    wsm = _mxu(kvn, w_ref[240:252, 0:192]) + wsm_idwt + row(R_B4, 192)          # (BB,192)

    # ---- BiAttn on the original image (structural per-channel form) ----------
    xc0, xc1, xc2 = x0[:, 0:64], x0[:, 64:128], x0[:, 128:192]
    mu3 = (xc0 + xc1 + xc2) * (1.0 / 3.0)                        # LayerNorm(3) stats
    d0, d1, d2 = xc0 - mu3, xc1 - mu3, xc2 - mu3
    inv3 = jax.lax.rsqrt((d0 * d0 + d1 * d1 + d2 * d2) * (1.0 / 3.0) + 1e-5)
    xn0 = d0 * inv3 * sc(S_GLN + 0) + sc(S_BLN + 0)
    xn1 = d1 * inv3 * sc(S_GLN + 1) + sc(S_BLN + 1)
    xn2 = d2 * inv3 * sc(S_GLN + 2) + sc(S_BLN + 2)
    # global avg-pool + global_reduce (pre-GELU), folded /64 into the weights
    xg = _gelu(jnp.sum(xn0, -1, keepdims=True) * sc(S_WGR + 0)
               + jnp.sum(xn1, -1, keepdims=True) * sc(S_WGR + 1)
               + jnp.sum(xn2, -1, keepdims=True) * sc(S_WGR + 2) + sc(S_BGR))   # (BB,1)
    # local_reduce per spatial position (3 -> 1)
    xl = _gelu(xn0 * sc(S_WLR + 0) + xn1 * sc(S_WLR + 1)
               + xn2 * sc(S_WLR + 2) + sc(S_BLR))                               # (BB,64)
    s_attn = _sigmoid(xl * sc(S_WSS_L) + xg * sc(S_WSS_G) + sc(S_BSS))          # (BB,64)
    bam0 = xc0 * (_sigmoid(xg * sc(S_WCS + 0) + sc(S_BCS + 0)) * s_attn)
    bam1 = xc1 * (_sigmoid(xg * sc(S_WCS + 1) + sc(S_BCS + 1)) * s_attn)
    bam2 = xc2 * (_sigmoid(xg * sc(S_WCS + 2) + sc(S_BCS + 2)) * s_attn)

    # ---- catConv(6->3) ∘ cf.catConv(3->3): per-position channel mix ----------
    cat = (wsm[:, 0:64], wsm[:, 64:128], wsm[:, 128:192], bam0, bam1, bam2)
    ych = []
    for c in range(3):
        acc = sc(S_BPRE + c)
        for j in range(6):
            acc = acc + cat[j] * sc(S_A6 + 6 * c + j)
        ych.append(acc)                                                          # (BB,64)

    # ---- LayerNorm([3,8,8]) over all 192 features + cf-conv2∘flatten∘linear1 -
    tot = (jnp.sum(ych[0], -1, keepdims=True) + jnp.sum(ych[1], -1, keepdims=True)
           + jnp.sum(ych[2], -1, keepdims=True))
    mu2 = tot * (1.0 / 192.0)
    dd = [ych[c] - mu2 for c in range(3)]
    var2 = (jnp.sum(dd[0] * dd[0], -1, keepdims=True)
            + jnp.sum(dd[1] * dd[1], -1, keepdims=True)
            + jnp.sum(dd[2] * dd[2], -1, keepdims=True)) * (1.0 / 192.0)
    inv2 = jax.lax.rsqrt(var2 + 1e-5)
    h = row(R_BH, 20)
    for c in range(3):
        yn = (dd[c] * inv2 * b_ref[R_GCF:R_GCF + 1, 64 * c:64 * (c + 1)]
              + b_ref[R_BCF:R_BCF + 1, 64 * c:64 * (c + 1)])
        h = h + _mxu(yn, w_ref[64 * c:64 * (c + 1), 128:148])                    # (BB,20)
    # nn.Dropout(0.2): identity at inference.
    o_ref[...] = _mxu(h, w_ref[304:324, 0:2]) + row(R_B2C, 2)                    # (BB,2)


# ----------------------------------------------------------------------------
# wrapper: 1-D batch grid, resident weights, sublane-filled batch blocks.
# ----------------------------------------------------------------------------
def _round_up(x, m):
    return ((x + m - 1) // m) * m


@jax.jit
def wbanet_forward(img, FP):
    B = img.shape[0]
    x0 = img.reshape(B, 3 * 8 * 8).astype(jnp.float32)       # NCHW flatten
    BB = min(_round_up(B, 8), 256)                            # >=8 rows per block
    Bp = _round_up(B, BB)
    if Bp != B:
        x0 = jnp.pad(x0, ((0, Bp - B), (0, 0)))
    nblk = Bp // BB
    wslab, bias = FP["wslab"], FP["bias"]
    out = pl.pallas_call(
        wbanet_kernel,
        out_shape=jax.ShapeDtypeStruct((Bp, 2), jnp.float32),
        grid_spec=pltpu.PrefetchScalarGridSpec(
            num_scalar_prefetch=0,
            grid=(nblk,),
            in_specs=[
                pl.BlockSpec((BB, 192), lambda i: (i, 0)),        # batch block
                pl.BlockSpec(wslab.shape, lambda i: (0, 0)),      # resident weights
                pl.BlockSpec(bias.shape, lambda i: (0, 0)),       # resident bias slab
            ],
            out_specs=pl.BlockSpec((BB, 2), lambda i: (i, 0)),
        ),
        compiler_params=pltpu.CompilerParams(
            dimension_semantics=("parallel",),                    # shard blocks over TCs
            vmem_limit_bytes=16 * 1024 * 1024,
        ),
    )(x0, wslab, bias)
    return out[:B]


# ----------------------------------------------------------------------------
# deterministic synthetic parameters (eval-mode BN folded to affine)
# ----------------------------------------------------------------------------
def init_params(key):
    keys = iter(jax.random.split(key, 64))

    def rnd(shape, scale=0.1):
        return scale * jax.random.normal(next(keys), shape, dtype=jnp.float32)

    def bn_fold(c):  # eval BatchNorm: running_mean=0, running_var=1, eps=1e-5
        gamma = 1.0 + rnd((c,))
        beta = rnd((c,))
        return gamma / jnp.sqrt(1.0 + 1e-5), beta

    P = {}
    # WSM: patch embedding, reduce (1x1 conv + BN); q projection is provably dead.
    P["w_pe"], P["b_pe"] = rnd((12, 12)), rnd((12,))
    P["w_red"], P["b_red"] = rnd((12, 3)), rnd((3,))
    P["bn1_s"], P["bn1_t"] = bn_fold(3)
    # filter: Conv2d(12,12,3,pad=1) + BN
    P["w_filt"], P["b_f"] = rnd((12, 12, 3, 3)), rnd((12,))
    P["bn2_s"], P["bn2_t"] = bn_fold(12)
    # kv_embed: Conv2d(12,12,k=2,s=2); kv: LayerNorm(12)+Linear(12,24); proj: Linear(15,12)
    P["w_kve"], P["b_kve"] = rnd((12, 12, 2, 2)), rnd((12,))
    P["g_kv"], P["b_kvln"] = 1.0 + rnd((12,)), rnd((12,))
    P["w_kv"], P["b_kv"] = rnd((12, 24)), rnd((24,))
    P["wp_a"], P["wp_i"], P["b_p"] = rnd((12, 12)), rnd((3, 12)), rnd((12,))
    # BiAttn
    P["g_ln"], P["b_ln"] = 1.0 + rnd((3,)), rnd((3,))
    P["w_gr"], P["b_gr"] = rnd((3, 1)), rnd((1,))
    P["w_lr"], P["b_lr"] = rnd((3, 1)), rnd((1,))
    P["w_cs"], P["b_cs"] = rnd((1, 3)), rnd((3,))
    P["w_ss"], P["b_ss"] = rnd((2,)), rnd((1,))
    # head: catConv(6->3), ConcactFeature (1x1 conv, LayerNorm([3,8,8]), 1x1 conv)
    P["w_cat"], P["b_cat"] = rnd((6, 3)), rnd((3,))
    P["w_cf1"], P["b_cf1"] = rnd((3, 3)), rnd((3,))
    P["g_cf"], P["b_cf"] = 1.0 + rnd((3, 8, 8)), rnd((3, 8, 8))
    P["w_cf2"], P["b_cf2"] = rnd((3, 3)), rnd((3,))
    # classifier (192 = 3*8*8 flattened in NCHW order)
    P["w1"], P["b1"] = rnd((192, 20)), rnd((20,))
    P["w2"], P["b2"] = rnd((20, 2)), rnd((2,))
    return P


# extract (W, b) with f(x) == x @ W + b for an affine f: R^n -> R^m
def _affine(f, n):
    b = f(jnp.zeros((n,), jnp.float32))
    W = jax.vmap(f)(jnp.eye(n, dtype=jnp.float32)) - b[None, :]
    return W, b


def fold_params(P):
    """Fold every constant / affine segment of the network into the two slabs.

    NOTE: the attention==1 simplification (softmax over a single kv token) and
    all the folds below are only valid for image_size=8, patch_size=2, dim=12,
    sr_ratio=2; changing any of those invalidates this layout.
    """

    # ---- WSM folds (flat index of an 8x8x3 image is NCHW: c*64 + h*8 + w) ----
    def f_reduce(x):  # img NCHW flat (192,) -> pre-ReLU reduced 4x4x3 map, (token, ch) flat
        img = x.reshape(3, 8, 8)
        p = img.reshape(3, 4, 2, 4, 2).transpose(1, 3, 2, 4, 0).reshape(16, 12)
        h = p @ P["w_pe"] + P["b_pe"]
        r = (h @ P["w_red"] + P["b_red"]) * P["bn1_s"] + P["bn1_t"]
        return r.reshape(48)

    def f_filter(rf):  # red flat (48,) -> pre-ReLU filtered DWT map, (pos, 12ch) flat
        r = rf.reshape(4, 4, 3)
        a = r[0::2, 0::2]; b = r[0::2, 1::2]; c = r[1::2, 0::2]; d = r[1::2, 1::2]
        ll = 0.5 * (a + b + c + d); lh = 0.5 * (a + b - c - d)
        hl = 0.5 * (a - b + c - d); hh = 0.5 * (a - b - c + d)
        xd = jnp.concatenate([ll, lh, hl, hh], axis=-1)          # (2,2,12)  [LL|LH|HL|HH]
        rows = []
        for oy in range(2):
            for ox in range(2):
                acc = P["b_f"]
                for iy in range(2):
                    for ix in range(2):
                        acc = acc + xd[iy, ix] @ P["w_filt"][:, :, iy - oy + 1, ix - ox + 1].T
                rows.append(acc)
        out = jnp.stack(rows, axis=0) * P["bn2_s"] + P["bn2_t"]  # (4,12), row = oy*2+ox
        return out.reshape(48)

    def f_kvembed(ff):  # filt flat (48,) -> kv token (12,)
        f = ff.reshape(2, 2, 12)
        out = P["b_kve"]
        for ky in range(2):
            for kx in range(2):
                out = out + f[ky, kx] @ P["w_kve"][:, :, ky, kx].T
        return out

    def f_attnproj(kvn):  # post-LN kv token (12,) -> attention half of WSM out, NCHW flat
        v = (kvn @ P["w_kv"] + P["b_kv"])[12:24]
        r = v @ P["wp_a"] + P["b_p"]                             # same row for all 16 tokens
        t = r.reshape(2, 2, 3)                                   # (p1, p2, c)
        w = jnp.broadcast_to(t[None, :, None, :, :], (4, 2, 4, 2, 3))   # (h,p1,w,p2,c)
        return w.transpose(4, 0, 1, 2, 3).reshape(192)           # (c, H, W) flat

    def f_idwtproj(ff):  # filt flat (48,) -> IDWT half of WSM out, NCHW flat
        f = ff.reshape(2, 2, 12)
        ll = f[..., 0:3]; lh = f[..., 3:6]; hl = f[..., 6:9]; hh = f[..., 9:12]
        xi = jnp.zeros((4, 4, 3), jnp.float32)
        xi = xi.at[0::2, 0::2].set(0.5 * (ll + lh + hl + hh))
        xi = xi.at[0::2, 1::2].set(0.5 * (ll + lh - hl - hh))
        xi = xi.at[1::2, 0::2].set(0.5 * (ll - lh + hl - hh))
        xi = xi.at[1::2, 1::2].set(0.5 * (ll - lh - hl + hh))
        txc = xi.reshape(16, 3) @ P["wp_i"]                      # (16, 12)
        return txc.reshape(4, 4, 2, 2, 3).transpose(4, 0, 2, 1, 3).reshape(192)

    def f_postnorm(y):  # post-LN (192,) -> cf-conv2 + NCHW-flatten + linear1 (20,)
        z = P["w_cf2"].T @ y.reshape(3, 64) + P["b_cf2"][:, None]
        return z.reshape(192) @ P["w1"] + P["b1"]

    W1, b1 = _affine(f_reduce, 192)        # (192,48)
    W2, b2 = _affine(f_filter, 48)         # (48,48)
    W3, b3 = _affine(f_kvembed, 48)        # (48,12)
    W4, b4 = _affine(f_attnproj, 12)       # (12,192)
    W5, _ = _affine(f_idwtproj, 48)        # (48,192)
    Whead, bhead = _affine(f_postnorm, 192)  # (192,20)

    # catConv(6->3) ∘ cf.catConv(3->3) per-position channel mix (3x6 + bias)
    A6 = P["w_cf1"].T @ P["w_cat"].T                             # (3,6)
    bpre3 = P["w_cf1"].T @ P["b_cat"] + P["b_cf1"]               # (3,)

    # ---- bf16 weight slab (single DMA of all MXU operands) --------------------
    w = jnp.zeros((W_ROWS, 192), jnp.float32)
    w = w.at[0:192, 0:48].set(W1)
    w = w.at[0:192, 128:148].set(Whead)
    w = w.at[192:240, 0:48].set(W2)
    w = w.at[192:240, 128:140].set(W3)
    w = w.at[240:252, 0:192].set(W4)
    w = w.at[256:304, 0:192].set(W5)
    w = w.at[304:324, 0:2].set(P["w2"])
    wslab = w.astype(jnp.bfloat16)

    # ---- f32 bias/scale slab (single DMA of all vectors + scalars) ------------
    b = jnp.zeros((B_ROWS, 192), jnp.float32)
    b = b.at[R_B1, 0:48].set(b1)
    b = b.at[R_B2, 0:48].set(b2)
    b = b.at[R_B3, 0:12].set(b3)
    b = b.at[R_GKV, 0:12].set(P["g_kv"])
    b = b.at[R_BKV, 0:12].set(P["b_kvln"])
    b = b.at[R_B4, 0:192].set(b4)
    b = b.at[R_GCF, 0:192].set(P["g_cf"].reshape(192))
    b = b.at[R_BCF, 0:192].set(P["b_cf"].reshape(192))
    b = b.at[R_BH, 0:20].set(bhead)
    b = b.at[R_B2C, 0:2].set(P["b2"])
    # scalar row
    b = b.at[R_SC, S_BGR].set(P["b_gr"][0])
    b = b.at[R_SC, S_BLR].set(P["b_lr"][0])
    b = b.at[R_SC, S_WCS:S_WCS + 3].set(P["w_cs"][0])
    b = b.at[R_SC, S_BCS:S_BCS + 3].set(P["b_cs"])
    b = b.at[R_SC, S_WSS_L].set(P["w_ss"][0])
    b = b.at[R_SC, S_WSS_G].set(P["w_ss"][1])
    b = b.at[R_SC, S_BSS].set(P["b_ss"][0])
    b = b.at[R_SC, S_WGR:S_WGR + 3].set(P["w_gr"][:, 0] / 64.0)   # avg-pool /64 folded
    b = b.at[R_SC, S_WLR:S_WLR + 3].set(P["w_lr"][:, 0])
    b = b.at[R_SC, S_GLN:S_GLN + 3].set(P["g_ln"])
    b = b.at[R_SC, S_BLN:S_BLN + 3].set(P["b_ln"])
    b = b.at[R_SC, S_A6:S_A6 + 18].set(A6.reshape(18))
    b = b.at[R_SC, S_BPRE:S_BPRE + 3].set(bpre3)

    return {"wslab": wslab, "bias": b}


# TODO(synk): the reference casts to float16 around the DWT/IDWT and uses
# training-mode Dropout / BatchNorm batch stats; here the MXU operands are bf16,
# elementwise math is f32, and semantics are eval-mode (identity dropout, folded
# running-stat BN).

if __name__ == "__main__":
    key = jax.random.PRNGKey(0)
    pkey, xkey = jax.random.split(key)
    params = fold_params(init_params(pkey))
    img = jax.random.normal(xkey, (2, 3, 8, 8), dtype=jnp.float32)
    out = jax.block_until_ready(wbanet_forward(img, params))
    assert out.shape == (2, 2) and out.dtype == jnp.float32
    assert bool(jnp.all(jnp.isfinite(out)))
    print("KERNEL_OK")
</pallas_src>

<mosaic_0001>
module attributes {stable_mosaic.version = 11 : i64} {
  func.func @wbanet_kernel(%arg0: i32, %arg1: memref<8x192xf32, #tpu.memory_space<vmem>>, %arg2: memref<324x192xbf16, #tpu.memory_space<vmem>>, %arg3: memref<11x192xf32, #tpu.memory_space<vmem>>, %arg4: memref<8x2xf32, #tpu.memory_space<vmem>>) attributes {dimension_semantics = [#tpu.dimension_semantics<parallel>], iteration_bounds = array<i64: 1>, scalar_prefetch = 0 : i64, scratch_operands = 0 : i64, tpu.core_type = #tpu.core_type<tc>, window_params = [{transform_indices = @transform_0, window_bounds = array<i64: 8, 192>}, {pipeline_mode = #tpu.pipeline_mode<synchronous>, transform_indices = @transform_1, window_bounds = array<i64: 324, 192>}, {pipeline_mode = #tpu.pipeline_mode<synchronous>, transform_indices = @transform_2, window_bounds = array<i64: 11, 192>}, {transform_indices = @transform_3, window_bounds = array<i64: 8, 2>}]} {
    %c0 = arith.constant 0 : index
    %c0_0 = arith.constant 0 : index
    %0 = vector.load %arg1[%c0, %c0_0] : memref<8x192xf32, #tpu.memory_space<vmem>>, vector<8x192xf32>
    %c0_1 = arith.constant 0 : index
    %c0_2 = arith.constant 0 : index
    %1 = vector.load %arg2[%c0_1, %c0_2] : memref<324x192xbf16, #tpu.memory_space<vmem>>, vector<192x48xbf16>
    %2 = arith.truncf %0 : vector<8x192xf32> to vector<8x192xbf16>
    %cst = arith.constant dense<0.000000e+00> : vector<8x48xf32>
    %3 = tpu.matmul %2, %1, %cst {dimension_numbers = #tpu.dot_dimension_numbers<[1], [0], [0], [1], [0, 0, 1, 1], [], []>} : vector<8x192xbf16>, vector<192x48xbf16>, vector<8x48xf32> -> vector<8x48xf32>
    %c0_3 = arith.constant 0 : index
    %c0_4 = arith.constant 0 : index
    %4 = vector.load %arg3[%c0_3, %c0_4] : memref<11x192xf32, #tpu.memory_space<vmem>>, vector<1x48xf32>
    %5 = vector.broadcast %4 : vector<1x48xf32> to vector<8x48xf32>
    %6 = arith.addf %3, %5 : vector<8x48xf32>
    %cst_5 = arith.constant 0.000000e+00 : f32
    %7 = vector.broadcast %cst_5 : f32 to vector<8x48xf32>
    %8 = arith.maximumf %6, %7 : vector<8x48xf32>
    %c192 = arith.constant 192 : index
    %c0_6 = arith.constant 0 : index
    %9 = vector.load %arg2[%c192, %c0_6] : memref<324x192xbf16, #tpu.memory_space<vmem>>, vector<48x48xbf16>
    %10 = arith.truncf %8 : vector<8x48xf32> to vector<8x48xbf16>
    %cst_7 = arith.constant dense<0.000000e+00> : vector<8x48xf32>
    %11 = tpu.matmul %10, %9, %cst_7 {dimension_numbers = #tpu.dot_dimension_numbers<[1], [0], [0], [1], [0, 0, 1, 1], [], []>} : vector<8x48xbf16>, vector<48x48xbf16>, vector<8x48xf32> -> vector<8x48xf32>
    %c1 = arith.constant 1 : index
    %c0_8 = arith.constant 0 : index
    %12 = vector.load %arg3[%c1, %c0_8] : memref<11x192xf32, #tpu.memory_space<vmem>>, vector<1x48xf32>
    %13 = vector.broadcast %12 : vector<1x48xf32> to vector<8x48xf32>
    %14 = arith.addf %11, %13 : vector<8x48xf32>
    %cst_9 = arith.constant 0.000000e+00 : f32
    %15 = vector.broadcast %cst_9 : f32 to vector<8x48xf32>
    %16 = arith.maximumf %14, %15 : vector<8x48xf32>
    %17 = arith.truncf %16 : vector<8x48xf32> to vector<8x48xbf16>
    %c256 = arith.constant 256 : index
    %c0_10 = arith.constant 0 : index
    %18 = vector.load %arg2[%c256, %c0_10] : memref<324x192xbf16, #tpu.memory_space<vmem>>, vector<48x192xbf16>
    %cst_11 = arith.constant dense<0.000000e+00> : vector<8x192xf32>
    %19 = tpu.matmul %17, %18, %cst_11 {dimension_numbers = #tpu.dot_dimension_numbers<[1], [0], [0], [1], [0, 0, 1, 1], [], []>} : vector<8x48xbf16>, vector<48x192xbf16>, vector<8x192xf32> -> vector<8x192xf32>
    %c192_12 = arith.constant 192 : index
    %c128 = arith.constant 128 : index
    %20 = vector.load %arg2[%c192_12, %c128] : memref<324x192xbf16, #tpu.memory_space<vmem>>, vector<48x12xbf16>
    %cst_13 = arith.constant dense<0.000000e+00> : vector<8x12xf32>
    %21 = tpu.matmul %17, %20, %cst_13 {dimension_numbers = #tpu.dot_dimension_numbers<[1], [0], [0], [1], [0, 0, 1, 1], [], []>} : vector<8x48xbf16>, vector<48x12xbf16>, vector<8x12xf32> -> vector<8x12xf32>
    %c2 = arith.constant 2 : index
    %c0_14 = arith.constant 0 : index
    %22 = vector.load %arg3[%c2, %c0_14] : memref<11x192xf32, #tpu.memory_space<vmem>>, vector<1x12xf32>
    %23 = vector.broadcast %22 : vector<1x12xf32> to vector<8x12xf32>
    %24 = arith.addf %21, %23 : vector<8x12xf32>
    %cst_15 = arith.constant dense<0.000000e+00> : vector<8xf32>
    %25 = vector.multi_reduction <add>, %24, %cst_15 [1] : vector<8x12xf32> to vector<8xf32>
    %26 = vector.shape_cast %25 : vector<8xf32> to vector<8x1xf32>
    %cst_16 = arith.constant 1.200000e+01 : f32
    %27 = vector.broadcast %cst_16 : f32 to vector<8x1xf32>
    %28 = arith.divf %26, %27 : vector<8x1xf32>
    %29 = vector.broadcast %28 : vector<8x1xf32> to vector<8x12xf32>
    %30 = arith.subf %24, %29 : vector<8x12xf32>
    %31 = arith.mulf %30, %30 : vector<8x12xf32>
    %cst_17 = arith.constant dense<0.000000e+00> : vector<8xf32>
    %32 = vector.multi_reduction <add>, %31, %cst_17 [1] : vector<8x12xf32> to vector<8xf32>
    %33 = vector.shape_cast %32 : vector<8xf32> to vector<8x1xf32>
    %cst_18 = arith.constant 1.200000e+01 : f32
    %34 = vector.broadcast %cst_18 : f32 to vector<8x1xf32>
    %35 = arith.divf %33, %34 : vector<8x1xf32>
    %36 = vector.broadcast %28 : vector<8x1xf32> to vector<8x12xf32>
    %37 = arith.subf %24, %36 : vector<8x12xf32>
    %cst_19 = arith.constant 9.99999974E-6 : f32
    %38 = vector.broadcast %cst_19 : f32 to vector<8x1xf32>
    %39 = arith.addf %35, %38 : vector<8x1xf32>
    %40 = math.rsqrt %39 : vector<8x1xf32>
    %41 = vector.broadcast %40 : vector<8x1xf32> to vector<8x12xf32>
    %42 = arith.mulf %37, %41 : vector<8x12xf32>
    %c3 = arith.constant 3 : index
    %c0_20 = arith.constant 0 : index
    %43 = vector.load %arg3[%c3, %c0_20] : memref<11x192xf32, #tpu.memory_space<vmem>>, vector<1x12xf32>
    %44 = vector.broadcast %43 : vector<1x12xf32> to vector<8x12xf32>
    %45 = arith.mulf %42, %44 : vector<8x12xf32>
    %c4 = arith.constant 4 : index
    %c0_21 = arith.constant 0 : index
    %46 = vector.load %arg3[%c4, %c0_21] : memref<11x192xf32, #tpu.memory_space<vmem>>, vector<1x12xf32>
    %47 = vector.broadcast %46 : vector<1x12xf32> to vector<8x12xf32>
    %48 = arith.addf %45, %47 : vector<8x12xf32>
    %c240 = arith.constant 240 : index
    %c0_22 = arith.constant 0 : index
    %49 = vector.load %arg2[%c240, %c0_22] : memref<324x192xbf16, #tpu.memory_space<vmem>>, vector<12x192xbf16>
    %50 = arith.truncf %48 : vector<8x12xf32> to vector<8x12xbf16>
    %cst_23 = arith.constant dense<0.000000e+00> : vector<8x192xf32>
    %51 = tpu.matmul %50, %49, %cst_23 {dimension_numbers = #tpu.dot_dimension_numbers<[1], [0], [0], [1], [0, 0, 1, 1], [], []>} : vector<8x12xbf16>, vector<12x192xbf16>, vector<8x192xf32> -> vector<8x192xf32>
    %52 = arith.addf %51, %19 : vector<8x192xf32>
    %c5 = arith.constant 5 : index
    %c0_24 = arith.constant 0 : index
    %53 = vector.load %arg3[%c5, %c0_24] : memref<11x192xf32, #tpu.memory_space<vmem>>, vector<1x192xf32>
    %54 = vector.broadcast %53 : vector<1x192xf32> to vector<8x192xf32>
    %55 = arith.addf %52, %54 : vector<8x192xf32>
    %56 = vector.extract_strided_slice %0 {offsets = [0, 0], sizes = [8, 64], strides = [1, 1]} : vector<8x192xf32> to vector<8x64xf32>
    %57 = vector.extract_strided_slice %0 {offsets = [0, 64], sizes = [8, 64], strides = [1, 1]} : vector<8x192xf32> to vector<8x64xf32>
    %58 = vector.extract_strided_slice %0 {offsets = [0, 128], sizes = [8, 64], strides = [1, 1]} : vector<8x192xf32> to vector<8x64xf32>
    %59 = arith.addf %56, %57 : vector<8x64xf32>
    %60 = arith.addf %59, %58 : vector<8x64xf32>
    %cst_25 = arith.constant 0.333333343 : f32
    %61 = vector.broadcast %cst_25 : f32 to vector<8x64xf32>
    %62 = arith.mulf %60, %61 : vector<8x64xf32>
    %63 = arith.subf %56, %62 : vector<8x64xf32>
    %64 = arith.subf %57, %62 : vector<8x64xf32>
    %65 = arith.subf %58, %62 : vector<8x64xf32>
    %66 = arith.mulf %63, %63 : vector<8x64xf32>
    %67 = arith.mulf %64, %64 : vector<8x64xf32>
    %68 = arith.addf %66, %67 : vector<8x64xf32>
    %69 = arith.mulf %65, %65 : vector<8x64xf32>
    %70 = arith.addf %68, %69 : vector<8x64xf32>
    %cst_26 = arith.constant 0.333333343 : f32
    %71 = vector.broadcast %cst_26 : f32 to vector<8x64xf32>
    %72 = arith.mulf %70, %71 : vector<8x64xf32>
    %cst_27 = arith.constant 9.99999974E-6 : f32
    %73 = vector.broadcast %cst_27 : f32 to vector<8x64xf32>
    %74 = arith.addf %72, %73 : vector<8x64xf32>
    %75 = math.rsqrt %74 : vector<8x64xf32>
    %76 = arith.mulf %63, %75 : vector<8x64xf32>
    %c10 = arith.constant 10 : index
    %c17 = arith.constant 17 : index
    %77 = vector.load %arg3[%c10, %c17] : memref<11x192xf32, #tpu.memory_space<vmem>>, vector<1x1xf32>
    %78 = vector.broadcast %77 : vector<1x1xf32> to vector<8x64xf32>
    %79 = arith.mulf %76, %78 : vector<8x64xf32>
    %c10_28 = arith.constant 10 : index
    %c20 = arith.constant 20 : index
    %80 = vector.load %arg3[%c10_28, %c20] : memref<11x192xf32, #tpu.memory_space<vmem>>, vector<1x1xf32>
    %81 = vector.broadcast %80 : vector<1x1xf32> to vector<8x64xf32>
    %82 = arith.addf %79, %81 : vector<8x64xf32>
    %83 = arith.mulf %64, %75 : vector<8x64xf32>
    %c10_29 = arith.constant 10 : index
    %c18 = arith.constant 18 : index
    %84 = vector.load %arg3[%c10_29, %c18] : memref<11x192xf32, #tpu.memory_space<vmem>>, vector<1x1xf32>
    %85 = vector.broadcast %84 : vector<1x1xf32> to vector<8x64xf32>
    %86 = arith.mulf %83, %85 : vector<8x64xf32>
    %c10_30 = arith.constant 10 : index
    %c21 = arith.constant 21 : index
    %87 = vector.load %arg3[%c10_30, %c21] : memref<11x192xf32, #tpu.memory_space<vmem>>, vector<1x1xf32>
    %88 = vector.broadcast %87 : vector<1x1xf32> to vector<8x64xf32>
    %89 = arith.addf %86, %88 : vector<8x64xf32>
    %90 = arith.mulf %65, %75 : vector<8x64xf32>
    %c10_31 = arith.constant 10 : index
    %c19 = arith.constant 19 : index
    %91 = vector.load %arg3[%c10_31, %c19] : memref<11x192xf32, #tpu.memory_space<vmem>>, vector<1x1xf32>
    %92 = vector.broadcast %91 : vector<1x1xf32> to vector<8x64xf32>
    %93 = arith.mulf %90, %92 : vector<8x64xf32>
    %c10_32 = arith.constant 10 : index
    %c22 = arith.constant 22 : index
    %94 = vector.load %arg3[%c10_32, %c22] : memref<11x192xf32, #tpu.memory_space<vmem>>, vector<1x1xf32>
    %95 = vector.broadcast %94 : vector<1x1xf32> to vector<8x64xf32>
    %96 = arith.addf %93, %95 : vector<8x64xf32>
    %cst_33 = arith.constant dense<0.000000e+00> : vector<8xf32>
    %97 = vector.multi_reduction <add>, %82, %cst_33 [1] : vector<8x64xf32> to vector<8xf32>
    %98 = vector.shape_cast %97 : vector<8xf32> to vector<8x1xf32>
    %c10_34 = arith.constant 10 : index
    %c11 = arith.constant 11 : index
    %99 = vector.load %arg3[%c10_34, %c11] : memref<11x192xf32, #tpu.memory_space<vmem>>, vector<1x1xf32>
    %100 = vector.broadcast %99 : vector<1x1xf32> to vector<8x1xf32>
    %101 = arith.mulf %98, %100 : vector<8x1xf32>
    %cst_35 = arith.constant dense<0.000000e+00> : vector<8xf32>
    %102 = vector.multi_reduction <add>, %89, %cst_35 [1] : vector<8x64xf32> to vector<8xf32>
    %103 = vector.shape_cast %102 : vector<8xf32> to vector<8x1xf32>
    %c10_36 = arith.constant 10 : index
    %c12 = arith.constant 12 : index
    %104 = vector.load %arg3[%c10_36, %c12] : memref<11x192xf32, #tpu.memory_space<vmem>>, vector<1x1xf32>
    %105 = vector.broadcast %104 : vector<1x1xf32> to vector<8x1xf32>
    %106 = arith.mulf %103, %105 : vector<8x1xf32>
    %107 = arith.addf %101, %106 : vector<8x1xf32>
    %cst_37 = arith.constant dense<0.000000e+00> : vector<8xf32>
    %108 = vector.multi_reduction <add>, %96, %cst_37 [1] : vector<8x64xf32> to vector<8xf32>
    %109 = vector.shape_cast %108 : vector<8xf32> to vector<8x1xf32>
    %c10_38 = arith.constant 10 : index
    %c13 = arith.constant 13 : index
    %110 = vector.load %arg3[%c10_38, %c13] : memref<11x192xf32, #tpu.memory_space<vmem>>, vector<1x1xf32>
    %111 = vector.broadcast %110 : vector<1x1xf32> to vector<8x1xf32>
    %112 = arith.mulf %109, %111 : vector<8x1xf32>
    %113 = arith.addf %107, %112 : vector<8x1xf32>
    %c10_39 = arith.constant 10 : index
    %c0_40 = arith.constant 0 : index
    %114 = vector.load %arg3[%c10_39, %c0_40] : memref<11x192xf32, #tpu.memory_space<vmem>>, vector<1x1xf32>
    %115 = vector.broadcast %114 : vector<1x1xf32> to vector<8x1xf32>
    %116 = arith.addf %113, %115 : vector<8x1xf32>
    %cst_41 = arith.constant 5.000000e-01 : f32
    %117 = vector.broadcast %cst_41 : f32 to vector<8x1xf32>
    %118 = arith.mulf %117, %116 : vector<8x1xf32>
    %cst_42 = arith.constant 0.707106769 : f32
    %119 = vector.broadcast %cst_42 : f32 to vector<8x1xf32>
    %120 = arith.mulf %116, %119 : vector<8x1xf32>
    %121 = math.absf %120 : vector<8x1xf32>
    %cst_43 = arith.constant 0.327591091 : f32
    %122 = vector.broadcast %cst_43 : f32 to vector<8x1xf32>
    %123 = arith.mulf %122, %121 : vector<8x1xf32>
    %cst_44 = arith.constant 1.000000e+00 : f32
    %124 = vector.broadcast %cst_44 : f32 to vector<8x1xf32>
    %125 = arith.addf %124, %123 : vector<8x1xf32>
    %cst_45 = arith.constant 1.000000e+00 : f32
    %126 = vector.broadcast %cst_45 : f32 to vector<8x1xf32>
    %127 = arith.divf %126, %125 : vector<8x1xf32>
    %cst_46 = arith.constant 1.06140542 : f32
    %128 = vector.broadcast %cst_46 : f32 to vector<8x1xf32>
    %129 = arith.mulf %127, %128 : vector<8x1xf32>
    %cst_47 = arith.constant -1.45315206 : f32
    %130 = vector.broadcast %cst_47 : f32 to vector<8x1xf32>
    %131 = arith.addf %130, %129 : vector<8x1xf32>
    %132 = arith.mulf %127, %131 : vector<8x1xf32>
    %cst_48 = arith.constant 1.42141378 : f32
    %133 = vector.broadcast %cst_48 : f32 to vector<8x1xf32>
    %134 = arith.addf %133, %132 : vector<8x1xf32>
    %135 = arith.mulf %127, %134 : vector<8x1xf32>
    %cst_49 = arith.constant -0.284496725 : f32
    %136 = vector.broadcast %cst_49 : f32 to vector<8x1xf32>
    %137 = arith.addf %136, %135 : vector<8x1xf32>
    %138 = arith.mulf %127, %137 : vector<8x1xf32>
    %cst_50 = arith.constant 0.254829586 : f32
    %139 = vector.broadcast %cst_50 : f32 to vector<8x1xf32>
    %140 = arith.addf %139, %138 : vector<8x1xf32>
    %141 = arith.mulf %127, %140 : vector<8x1xf32>
    %cst_51 = arith.constant 0.000000e+00 : f32
    %142 = vector.broadcast %cst_51 : f32 to vector<8x1xf32>
    %143 = arith.subf %142, %121 : vector<8x1xf32>
    %144 = arith.mulf %143, %121 : vector<8x1xf32>
    %145 = math.exp %144 : vector<8x1xf32>
    %146 = arith.mulf %141, %145 : vector<8x1xf32>
    %cst_52 = arith.constant 1.000000e+00 : f32
    %147 = vector.broadcast %cst_52 : f32 to vector<8x1xf32>
    %148 = arith.subf %147, %146 : vector<8x1xf32>
    %cst_53 = arith.constant 0.000000e+00 : f32
    %149 = vector.broadcast %cst_53 : f32 to vector<8x1xf32>
    %150 = arith.cmpf oge, %120, %149 : vector<8x1xf32>
    %cst_54 = arith.constant 0.000000e+00 : f32
    %151 = vector.broadcast %cst_54 : f32 to vector<8x1xf32>
    %152 = arith.subf %151, %148 : vector<8x1xf32>
    %153 = arith.select %150, %148, %152 : vector<8x1xi1>, vector<8x1xf32>
    %cst_55 = arith.constant 1.000000e+00 : f32
    %154 = vector.broadcast %cst_55 : f32 to vector<8x1xf32>
    %155 = arith.addf %154, %153 : vector<8x1xf32>
    %156 = arith.mulf %118, %155 : vector<8x1xf32>
    %c10_56 = arith.constant 10 : index
    %c14 = arith.constant 14 : index
    %157 = vector.load %arg3[%c10_56, %c14] : memref<11x192xf32, #tpu.memory_space<vmem>>, vector<1x1xf32>
    %158 = vector.broadcast %157 : vector<1x1xf32> to vector<8x64xf32>
    %159 = arith.mulf %82, %158 : vector<8x64xf32>
    %c10_57 = arith.constant 10 : index
    %c15 = arith.constant 15 : index
    %160 = vector.load %arg3[%c10_57, %c15] : memref<11x192xf32, #tpu.memory_space<vmem>>, vector<1x1xf32>
    %161 = vector.broadcast %160 : vector<1x1xf32> to vector<8x64xf32>
    %162 = arith.mulf %89, %161 : vector<8x64xf32>
    %163 = arith.addf %159, %162 : vector<8x64xf32>
    %c10_58 = arith.constant 10 : index
    %c16 = arith.constant 16 : index
    %164 = vector.load %arg3[%c10_58, %c16] : memref<11x192xf32, #tpu.memory_space<vmem>>, vector<1x1xf32>
    %165 = vector.broadcast %164 : vector<1x1xf32> to vector<8x64xf32>
    %166 = arith.mulf %96, %165 : vector<8x64xf32>
    %167 = arith.addf %163, %166 : vector<8x64xf32>
    %c10_59 = arith.constant 10 : index
    %c1_60 = arith.constant 1 : index
    %168 = vector.load %arg3[%c10_59, %c1_60] : memref<11x192xf32, #tpu.memory_space<vmem>>, vector<1x1xf32>
    %169 = vector.broadcast %168 : vector<1x1xf32> to vector<8x64xf32>
    %170 = arith.addf %167, %169 : vector<8x64xf32>
    %cst_61 = arith.constant 5.000000e-01 : f32
    %171 = vector.broadcast %cst_61 : f32 to vector<8x64xf32>
    %172 = arith.mulf %171, %170 : vector<8x64xf32>
    %cst_62 = arith.constant 0.707106769 : f32
    %173 = vector.broadcast %cst_62 : f32 to vector<8x64xf32>
    %174 = arith.mulf %170, %173 : vector<8x64xf32>
    %175 = math.absf %174 : vector<8x64xf32>
    %cst_63 = arith.constant 0.327591091 : f32
    %176 = vector.broadcast %cst_63 : f32 to vector<8x64xf32>
    %177 = arith.mulf %176, %175 : vector<8x64xf32>
    %cst_64 = arith.constant 1.000000e+00 : f32
    %178 = vector.broadcast %cst_64 : f32 to vector<8x64xf32>
    %179 = arith.addf %178, %177 : vector<8x64xf32>
    %cst_65 = arith.constant 1.000000e+00 : f32
    %180 = vector.broadcast %cst_65 : f32 to vector<8x64xf32>
    %181 = arith.divf %180, %179 : vector<8x64xf32>
    %cst_66 = arith.constant 1.06140542 : f32
    %182 = vector.broadcast %cst_66 : f32 to vector<8x64xf32>
    %183 = arith.mulf %181, %182 : vector<8x64xf32>
    %cst_67 = arith.constant -1.45315206 : f32
    %184 = vector.broadcast %cst_67 : f32 to vector<8x64xf32>
    %185 = arith.addf %184, %183 : vector<8x64xf32>
    %186 = arith.mulf %181, %185 : vector<8x64xf32>
    %cst_68 = arith.constant 1.42141378 : f32
    %187 = vector.broadcast %cst_68 : f32 to vector<8x64xf32>
    %188 = arith.addf %187, %186 : vector<8x64xf32>
    %189 = arith.mulf %181, %188 : vector<8x64xf32>
    %cst_69 = arith.constant -0.284496725 : f32
    %190 = vector.broadcast %cst_69 : f32 to vector<8x64xf32>
    %191 = arith.addf %190, %189 : vector<8x64xf32>
    %192 = arith.mulf %181, %191 : vector<8x64xf32>
    %cst_70 = arith.constant 0.254829586 : f32
    %193 = vector.broadcast %cst_70 : f32 to vector<8x64xf32>
    %194 = arith.addf %193, %192 : vector<8x64xf32>
    %195 = arith.mulf %181, %194 : vector<8x64xf32>
    %cst_71 = arith.constant 0.000000e+00 : f32
    %196 = vector.broadcast %cst_71 : f32 to vector<8x64xf32>
    %197 = arith.subf %196, %175 : vector<8x64xf32>
    %198 = arith.mulf %197, %175 : vector<8x64xf32>
    %199 = math.exp %198 : vector<8x64xf32>
    %200 = arith.mulf %195, %199 : vector<8x64xf32>
    %cst_72 = arith.constant 1.000000e+00 : f32
    %201 = vector.broadcast %cst_72 : f32 to vector<8x64xf32>
    %202 = arith.subf %201, %200 : vector<8x64xf32>
    %cst_73 = arith.constant 0.000000e+00 : f32
    %203 = vector.broadcast %cst_73 : f32 to vector<8x64xf32>
    %204 = arith.cmpf oge, %174, %203 : vector<8x64xf32>
    %cst_74 = arith.constant 0.000000e+00 : f32
    %205 = vector.broadcast %cst_74 : f32 to vector<8x64xf32>
    %206 = arith.subf %205, %202 : vector<8x64xf32>
    %207 = arith.select %204, %202, %206 : vector<8x64xi1>, vector<8x64xf32>
    %cst_75 = arith.constant 1.000000e+00 : f32
    %208 = vector.broadcast %cst_75 : f32 to vector<8x64xf32>
    %209 = arith.addf %208, %207 : vector<8x64xf32>
    %210 = arith.mulf %172, %209 : vector<8x64xf32>
    %c10_76 = arith.constant 10 : index
    %c8 = arith.constant 8 : index
    %211 = vector.load %arg3[%c10_76, %c8] : memref<11x192xf32, #tpu.memory_space<vmem>>, vector<1x1xf32>
    %212 = vector.broadcast %211 : vector<1x1xf32> to vector<8x64xf32>
    %213 = arith.mulf %210, %212 : vector<8x64xf32>
    %c10_77 = arith.constant 10 : index
    %c9 = arith.constant 9 : index
    %214 = vector.load %arg3[%c10_77, %c9] : memref<11x192xf32, #tpu.memory_space<vmem>>, vector<1x1xf32>
    %215 = vector.broadcast %214 : vector<1x1xf32> to vector<8x1xf32>
    %216 = arith.mulf %156, %215 : vector<8x1xf32>
    %217 = vector.broadcast %216 : vector<8x1xf32> to vector<8x64xf32>
    %218 = arith.addf %213, %217 : vector<8x64xf32>
    %c10_78 = arith.constant 10 : index
    %c10_79 = arith.constant 10 : index
    %219 = vector.load %arg3[%c10_78, %c10_79] : memref<11x192xf32, #tpu.memory_space<vmem>>, vector<1x1xf32>
    %220 = vector.broadcast %219 : vector<1x1xf32> to vector<8x64xf32>
    %221 = arith.addf %218, %220 : vector<8x64xf32>
    %cst_80 = arith.constant 0.000000e+00 : f32
    %222 = vector.broadcast %cst_80 : f32 to vector<8x64xf32>
    %223 = arith.subf %222, %221 : vector<8x64xf32>
    %224 = math.exp %223 : vector<8x64xf32>
    %cst_81 = arith.constant 1.000000e+00 : f32
    %225 = vector.broadcast %cst_81 : f32 to vector<8x64xf32>
    %226 = arith.addf %225, %224 : vector<8x64xf32>
    %cst_82 = arith.constant 1.000000e+00 : f32
    %227 = vector.broadcast %cst_82 : f32 to vector<8x64xf32>
    %228 = arith.divf %227, %226 : vector<8x64xf32>
    %c10_83 = arith.constant 10 : index
    %c2_84 = arith.constant 2 : index
    %229 = vector.load %arg3[%c10_83, %c2_84] : memref<11x192xf32, #tpu.memory_space<vmem>>, vector<1x1xf32>
    %230 = vector.broadcast %229 : vector<1x1xf32> to vector<8x1xf32>
    %231 = arith.mulf %156, %230 : vector<8x1xf32>
    %c10_85 = arith.constant 10 : index
    %c5_86 = arith.constant 5 : index
    %232 = vector.load %arg3[%c10_85, %c5_86] : memref<11x192xf32, #tpu.memory_space<vmem>>, vector<1x1xf32>
    %233 = vector.broadcast %232 : vector<1x1xf32> to vector<8x1xf32>
    %234 = arith.addf %231, %233 : vector<8x1xf32>
    %cst_87 = arith.constant 0.000000e+00 : f32
    %235 = vector.broadcast %cst_87 : f32 to vector<8x1xf32>
    %236 = arith.subf %235, %234 : vector<8x1xf32>
    %237 = math.exp %236 : vector<8x1xf32>
    %cst_88 = arith.constant 1.000000e+00 : f32
    %238 = vector.broadcast %cst_88 : f32 to vector<8x1xf32>
    %239 = arith.addf %238, %237 : vector<8x1xf32>
    %cst_89 = arith.constant 1.000000e+00 : f32
    %240 = vector.broadcast %cst_89 : f32 to vector<8x1xf32>
    %241 = arith.divf %240, %239 : vector<8x1xf32>
    %242 = vector.broadcast %241 : vector<8x1xf32> to vector<8x64xf32>
    %243 = arith.mulf %242, %228 : vector<8x64xf32>
    %244 = arith.mulf %56, %243 : vector<8x64xf32>
    %c10_90 = arith.constant 10 : index
    %c3_91 = arith.constant 3 : index
    %245 = vector.load %arg3[%c10_90, %c3_91] : memref<11x192xf32, #tpu.memory_space<vmem>>, vector<1x1xf32>
    %246 = vector.broadcast %245 : vector<1x1xf32> to vector<8x1xf32>
    %247 = arith.mulf %156, %246 : vector<8x1xf32>
    %c10_92 = arith.constant 10 : index
    %c6 = arith.constant 6 : index
    %248 = vector.load %arg3[%c10_92, %c6] : memref<11x192xf32, #tpu.memory_space<vmem>>, vector<1x1xf32>
    %249 = vector.broadcast %248 : vector<1x1xf32> to vector<8x1xf32>
    %250 = arith.addf %247, %249 : vector<8x1xf32>
    %cst_93 = arith.constant 0.000000e+00 : f32
    %251 = vector.broadcast %cst_93 : f32 to vector<8x1xf32>
    %252 = arith.subf %251, %250 : vector<8x1xf32>
    %253 = math.exp %252 : vector<8x1xf32>
    %cst_94 = arith.constant 1.000000e+00 : f32
    %254 = vector.broadcast %cst_94 : f32 to vector<8x1xf32>
    %255 = arith.addf %254, %253 : vector<8x1xf32>
    %cst_95 = arith.constant 1.000000e+00 : f32
    %256 = vector.broadcast %cst_95 : f32 to vector<8x1xf32>
    %257 = arith.divf %256, %255 : vector<8x1xf32>
    %258 = vector.broadcast %257 : vector<8x1xf32> to vector<8x64xf32>
    %259 = arith.mulf %258, %228 : vector<8x64xf32>
    %260 = arith.mulf %57, %259 : vector<8x64xf32>
    %c10_96 = arith.constant 10 : index
    %c4_97 = arith.constant 4 : index
    %261 = vector.load %arg3[%c10_96, %c4_97] : memref<11x192xf32, #tpu.memory_space<vmem>>, vector<1x1xf32>
    %262 = vector.broadcast %261 : vector<1x1xf32> to vector<8x1xf32>
    %263 = arith.mulf %156, %262 : vector<8x1xf32>
    %c10_98 = arith.constant 10 : index
    %c7 = arith.constant 7 : index
    %264 = vector.load %arg3[%c10_98, %c7] : memref<11x192xf32, #tpu.memory_space<vmem>>, vector<1x1xf32>
    %265 = vector.broadcast %264 : vector<1x1xf32> to vector<8x1xf32>
    %266 = arith.addf %263, %265 : vector<8x1xf32>
    %cst_99 = arith.constant 0.000000e+00 : f32
    %267 = vector.broadcast %cst_99 : f32 to vector<8x1xf32>
    %268 = arith.subf %267, %266 : vector<8x1xf32>
    %269 = math.exp %268 : vector<8x1xf32>
    %cst_100 = arith.constant 1.000000e+00 : f32
    %270 = vector.broadcast %cst_100 : f32 to vector<8x1xf32>
    %271 = arith.addf %270, %269 : vector<8x1xf32>
    %cst_101 = arith.constant 1.000000e+00 : f32
    %272 = vector.broadcast %cst_101 : f32 to vector<8x1xf32>
    %273 = arith.divf %272, %271 : vector<8x1xf32>
    %274 = vector.broadcast %273 : vector<8x1xf32> to vector<8x64xf32>
    %275 = arith.mulf %274, %228 : vector<8x64xf32>
    %276 = arith.mulf %58, %275 : vector<8x64xf32>
    %277 = vector.extract_strided_slice %55 {offsets = [0, 0], sizes = [8, 64], strides = [1, 1]} : vector<8x192xf32> to vector<8x64xf32>
    %278 = vector.extract_strided_slice %55 {offsets = [0, 64], sizes = [8, 64], strides = [1, 1]} : vector<8x192xf32> to vector<8x64xf32>
    %279 = vector.extract_strided_slice %55 {offsets = [0, 128], sizes = [8, 64], strides = [1, 1]} : vector<8x192xf32> to vector<8x64xf32>
    %c10_102 = arith.constant 10 : index
    %c42 = arith.constant 42 : index
    %280 = vector.load %arg3[%c10_102, %c42] : memref<11x192xf32, #tpu.memory_space<vmem>>, vector<1x1xf32>
    %c10_103 = arith.constant 10 : index
    %c24 = arith.constant 24 : index
    %281 = vector.load %arg3[%c10_103, %c24] : memref<11x192xf32, #tpu.memory_space<vmem>>, vector<1x1xf32>
    %282 = vector.broadcast %281 : vector<1x1xf32> to vector<8x64xf32>
    %283 = arith.mulf %277, %282 : vector<8x64xf32>
    %284 = vector.broadcast %280 : vector<1x1xf32> to vector<8x64xf32>
    %285 = arith.addf %284, %283 : vector<8x64xf32>
    %c10_104 = arith.constant 10 : index
    %c25 = arith.constant 25 : index
    %286 = vector.load %arg3[%c10_104, %c25] : memref<11x192xf32, #tpu.memory_space<vmem>>, vector<1x1xf32>
    %287 = vector.broadcast %286 : vector<1x1xf32> to vector<8x64xf32>
    %288 = arith.mulf %278, %287 : vector<8x64xf32>
    %289 = arith.addf %285, %288 : vector<8x64xf32>
    %c10_105 = arith.constant 10 : index
    %c26 = arith.constant 26 : index
    %290 = vector.load %arg3[%c10_105, %c26] : memref<11x192xf32, #tpu.memory_space<vmem>>, vector<1x1xf32>
    %291 = vector.broadcast %290 : vector<1x1xf32> to vector<8x64xf32>
    %292 = arith.mulf %279, %291 : vector<8x64xf32>
    %293 = arith.addf %289, %292 : vector<8x64xf32>
    %c10_106 = arith.constant 10 : index
    %c27 = arith.constant 27 : index
    %294 = vector.load %arg3[%c10_106, %c27] : memref<11x192xf32, #tpu.memory_space<vmem>>, vector<1x1xf32>
    %295 = vector.broadcast %294 : vector<1x1xf32> to vector<8x64xf32>
    %296 = arith.mulf %244, %295 : vector<8x64xf32>
    %297 = arith.addf %293, %296 : vector<8x64xf32>
    %c10_107 = arith.constant 10 : index
    %c28 = arith.constant 28 : index
    %298 = vector.load %arg3[%c10_107, %c28] : memref<11x192xf32, #tpu.memory_space<vmem>>, vector<1x1xf32>
    %299 = vector.broadcast %298 : vector<1x1xf32> to vector<8x64xf32>
    %300 = arith.mulf %260, %299 : vector<8x64xf32>
    %301 = arith.addf %297, %300 : vector<8x64xf32>
    %c10_108 = arith.constant 10 : index
    %c29 = arith.constant 29 : index
    %302 = vector.load %arg3[%c10_108, %c29] : memref<11x192xf32, #tpu.memory_space<vmem>>, vector<1x1xf32>
    %303 = vector.broadcast %302 : vector<1x1xf32> to vector<8x64xf32>
    %304 = arith.mulf %276, %303 : vector<8x64xf32>
    %305 = arith.addf %301, %304 : vector<8x64xf32>
    %c10_109 = arith.constant 10 : index
    %c43 = arith.constant 43 : index
    %306 = vector.load %arg3[%c10_109, %c43] : memref<11x192xf32, #tpu.memory_space<vmem>>, vector<1x1xf32>
    %c10_110 = arith.constant 10 : index
    %c30 = arith.constant 30 : index
    %307 = vector.load %arg3[%c10_110, %c30] : memref<11x192xf32, #tpu.memory_space<vmem>>, vector<1x1xf32>
    %308 = vector.broadcast %307 : vector<1x1xf32> to vector<8x64xf32>
    %309 = arith.mulf %277, %308 : vector<8x64xf32>
    %310 = vector.broadcast %306 : vector<1x1xf32> to vector<8x64xf32>
    %311 = arith.addf %310, %309 : vector<8x64xf32>
    %c10_111 = arith.constant 10 : index
    %c31 = arith.constant 31 : index
    %312 = vector.load %arg3[%c10_111, %c31] : memref<11x192xf32, #tpu.memory_space<vmem>>, vector<1x1xf32>
    %313 = vector.broadcast %312 : vector<1x1xf32> to vector<8x64xf32>
    %314 = arith.mulf %278, %313 : vector<8x64xf32>
    %315 = arith.addf %311, %314 : vector<8x64xf32>
    %c10_112 = arith.constant 10 : index
    %c32 = arith.constant 32 : index
    %316 = vector.load %arg3[%c10_112, %c32] : memref<11x192xf32, #tpu.memory_space<vmem>>, vector<1x1xf32>
    %317 = vector.broadcast %316 : vector<1x1xf32> to vector<8x64xf32>
    %318 = arith.mulf %279, %317 : vector<8x64xf32>
    %319 = arith.addf %315, %318 : vector<8x64xf32>
    %c10_113 = arith.constant 10 : index
    %c33 = arith.constant 33 : index
    %320 = vector.load %arg3[%c10_113, %c33] : memref<11x192xf32, #tpu.memory_space<vmem>>, vector<1x1xf32>
    %321 = vector.broadcast %320 : vector<1x1xf32> to vector<8x64xf32>
    %322 = arith.mulf %244, %321 : vector<8x64xf32>
    %323 = arith.addf %319, %322 : vector<8x64xf32>
    %c10_114 = arith.constant 10 : index
    %c34 = arith.constant 34 : index
    %324 = vector.load %arg3[%c10_114, %c34] : memref<11x192xf32, #tpu.memory_space<vmem>>, vector<1x1xf32>
    %325 = vector.broadcast %324 : vector<1x1xf32> to vector<8x64xf32>
    %326 = arith.mulf %260, %325 : vector<8x64xf32>
    %327 = arith.addf %323, %326 : vector<8x64xf32>
    %c10_115 = arith.constant 10 : index
    %c35 = arith.constant 35 : index
    %328 = vector.load %arg3[%c10_115, %c35] : memref<11x192xf32, #tpu.memory_space<vmem>>, vector<1x1xf32>
    %329 = vector.broadcast %328 : vector<1x1xf32> to vector<8x64xf32>
    %330 = arith.mulf %276, %329 : vector<8x64xf32>
    %331 = arith.addf %327, %330 : vector<8x64xf32>
    %c10_116 = arith.constant 10 : index
    %c44 = arith.constant 44 : index
    %332 = vector.load %arg3[%c10_116, %c44] : memref<11x192xf32, #tpu.memory_space<vmem>>, vector<1x1xf32>
    %c10_117 = arith.constant 10 : index
    %c36 = arith.constant 36 : index
    %333 = vector.load %arg3[%c10_117, %c36] : memref<11x192xf32, #tpu.memory_space<vmem>>, vector<1x1xf32>
    %334 = vector.broadcast %333 : vector<1x1xf32> to vector<8x64xf32>
    %335 = arith.mulf %277, %334 : vector<8x64xf32>
    %336 = vector.broadcast %332 : vector<1x1xf32> to vector<8x64xf32>
    %337 = arith.addf %336, %335 : vector<8x64xf32>
    %c10_118 = arith.constant 10 : index
    %c37 = arith.constant 37 : index
    %338 = vector.load %arg3[%c10_118, %c37] : memref<11x192xf32, #tpu.memory_space<vmem>>, vector<1x1xf32>
    %339 = vector.broadcast %338 : vector<1x1xf32> to vector<8x64xf32>
    %340 = arith.mulf %278, %339 : vector<8x64xf32>
    %341 = arith.addf %337, %340 : vector<8x64xf32>
    %c10_119 = arith.constant 10 : index
    %c38 = arith.constant 38 : index
    %342 = vector.load %arg3[%c10_119, %c38] : memref<11x192xf32, #tpu.memory_space<vmem>>, vector<1x1xf32>
    %343 = vector.broadcast %342 : vector<1x1xf32> to vector<8x64xf32>
    %344 = arith.mulf %279, %343 : vector<8x64xf32>
    %345 = arith.addf %341, %344 : vector<8x64xf32>
    %c10_120 = arith.constant 10 : index
    %c39 = arith.constant 39 : index
    %346 = vector.load %arg3[%c10_120, %c39] : memref<11x192xf32, #tpu.memory_space<vmem>>, vector<1x1xf32>
    %347 = vector.broadcast %346 : vector<1x1xf32> to vector<8x64xf32>
    %348 = arith.mulf %244, %347 : vector<8x64xf32>
    %349 = arith.addf %345, %348 : vector<8x64xf32>
    %c10_121 = arith.constant 10 : index
    %c40 = arith.constant 40 : index
    %350 = vector.load %arg3[%c10_121, %c40] : memref<11x192xf32, #tpu.memory_space<vmem>>, vector<1x1xf32>
    %351 = vector.broadcast %350 : vector<1x1xf32> to vector<8x64xf32>
    %352 = arith.mulf %260, %351 : vector<8x64xf32>
    %353 = arith.addf %349, %352 : vector<8x64xf32>
    %c10_122 = arith.constant 10 : index
    %c41 = arith.constant 41 : index
    %354 = vector.load %arg3[%c10_122, %c41] : memref<11x192xf32, #tpu.memory_space<vmem>>, vector<1x1xf32>
    %355 = vector.broadcast %354 : vector<1x1xf32> to vector<8x64xf32>
    %356 = arith.mulf %276, %355 : vector<8x64xf32>
    %357 = arith.addf %353, %356 : vector<8x64xf32>
    %cst_123 = arith.constant dense<0.000000e+00> : vector<8xf32>
    %358 = vector.multi_reduction <add>, %305, %cst_123 [1] : vector<8x64xf32> to vector<8xf32>
    %359 = vector.shape_cast %358 : vector<8xf32> to vector<8x1xf32>
    %cst_124 = arith.constant dense<0.000000e+00> : vector<8xf32>
    %360 = vector.multi_reduction <add>, %331, %cst_124 [1] : vector<8x64xf32> to vector<8xf32>
    %361 = vector.shape_cast %360 : vector<8xf32> to vector<8x1xf32>
    %362 = arith.addf %359, %361 : vector<8x1xf32>
    %cst_125 = arith.constant dense<0.000000e+00> : vector<8xf32>
    %363 = vector.multi_reduction <add>, %357, %cst_125 [1] : vector<8x64xf32> to vector<8xf32>
    %364 = vector.shape_cast %363 : vector<8xf32> to vector<8x1xf32>
    %365 = arith.addf %362, %364 : vector<8x1xf32>
    %cst_126 = arith.constant 0.00520833349 : f32
    %366 = vector.broadcast %cst_126 : f32 to vector<8x1xf32>
    %367 = arith.mulf %365, %366 : vector<8x1xf32>
    %368 = vector.broadcast %367 : vector<8x1xf32> to vector<8x64xf32>
    %369 = arith.subf %305, %368 : vector<8x64xf32>
    %370 = vector.broadcast %367 : vector<8x1xf32> to vector<8x64xf32>
    %371 = arith.subf %331, %370 : vector<8x64xf32>
    %372 = vector.broadcast %367 : vector<8x1xf32> to vector<8x64xf32>
    %373 = arith.subf %357, %372 : vector<8x64xf32>
    %374 = arith.mulf %369, %369 : vector<8x64xf32>
    %cst_127 = arith.constant dense<0.000000e+00> : vector<8xf32>
    %375 = vector.multi_reduction <add>, %374, %cst_127 [1] : vector<8x64xf32> to vector<8xf32>
    %376 = vector.shape_cast %375 : vector<8xf32> to vector<8x1xf32>
    %377 = arith.mulf %371, %371 : vector<8x64xf32>
    %cst_128 = arith.constant dense<0.000000e+00> : vector<8xf32>
    %378 = vector.multi_reduction <add>, %377, %cst_128 [1] : vector<8x64xf32> to vector<8xf32>
    %379 = vector.shape_cast %378 : vector<8xf32> to vector<8x1xf32>
    %380 = arith.addf %376, %379 : vector<8x1xf32>
    %381 = arith.mulf %373, %373 : vector<8x64xf32>
    %cst_129 = arith.constant dense<0.000000e+00> : vector<8xf32>
    %382 = vector.multi_reduction <add>, %381, %cst_129 [1] : vector<8x64xf32> to vector<8xf32>
    %383 = vector.shape_cast %382 : vector<8xf32> to vector<8x1xf32>
    %384 = arith.addf %380, %383 : vector<8x1xf32>
    %cst_130 = arith.constant 0.00520833349 : f32
    %385 = vector.broadcast %cst_130 : f32 to vector<8x1xf32>
    %386 = arith.mulf %384, %385 : vector<8x1xf32>
    %cst_131 = arith.constant 9.99999974E-6 : f32
    %387 = vector.broadcast %cst_131 : f32 to vector<8x1xf32>
    %388 = arith.addf %386, %387 : vector<8x1xf32>
    %389 = math.rsqrt %388 : vector<8x1xf32>
    %c8_132 = arith.constant 8 : index
    %c0_133 = arith.constant 0 : index
    %390 = vector.load %arg3[%c8_132, %c0_133] : memref<11x192xf32, #tpu.memory_space<vmem>>, vector<1x20xf32>
    %391 = vector.broadcast %389 : vector<8x1xf32> to vector<8x64xf32>
    %392 = arith.mulf %369, %391 : vector<8x64xf32>
    %c6_134 = arith.constant 6 : index
    %c0_135 = arith.constant 0 : index
    %393 = vector.load %arg3[%c6_134, %c0_135] : memref<11x192xf32, #tpu.memory_space<vmem>>, vector<1x64xf32>
    %394 = vector.broadcast %393 : vector<1x64xf32> to vector<8x64xf32>
    %395 = arith.mulf %392, %394 : vector<8x64xf32>
    %c7_136 = arith.constant 7 : index
    %c0_137 = arith.constant 0 : index
    %396 = vector.load %arg3[%c7_136, %c0_137] : memref<11x192xf32, #tpu.memory_space<vmem>>, vector<1x64xf32>
    %397 = vector.broadcast %396 : vector<1x64xf32> to vector<8x64xf32>
    %398 = arith.addf %395, %397 : vector<8x64xf32>
    %c0_138 = arith.constant 0 : index
    %c128_139 = arith.constant 128 : index
    %399 = vector.load %arg2[%c0_138, %c128_139] : memref<324x192xbf16, #tpu.memory_space<vmem>>, vector<64x20xbf16>
    %400 = arith.truncf %398 : vector<8x64xf32> to vector<8x64xbf16>
    %cst_140 = arith.constant dense<0.000000e+00> : vector<8x20xf32>
    %401 = tpu.matmul %400, %399, %cst_140 {dimension_numbers = #tpu.dot_dimension_numbers<[1], [0], [0], [1], [0, 0, 1, 1], [], []>} : vector<8x64xbf16>, vector<64x20xbf16>, vector<8x20xf32> -> vector<8x20xf32>
    %402 = vector.broadcast %390 : vector<1x20xf32> to vector<8x20xf32>
    %403 = arith.addf %402, %401 : vector<8x20xf32>
    %404 = vector.broadcast %389 : vector<8x1xf32> to vector<8x64xf32>
    %405 = arith.mulf %371, %404 : vector<8x64xf32>
    %c6_141 = arith.constant 6 : index
    %c64 = arith.constant 64 : index
    %406 = vector.load %arg3[%c6_141, %c64] : memref<11x192xf32, #tpu.memory_space<vmem>>, vector<1x64xf32>
    %407 = vector.broadcast %406 : vector<1x64xf32> to vector<8x64xf32>
    %408 = arith.mulf %405, %407 : vector<8x64xf32>
    %c7_142 = arith.constant 7 : index
    %c64_143 = arith.constant 64 : index
    %409 = vector.load %arg3[%c7_142, %c64_143] : memref<11x192xf32, #tpu.memory_space<vmem>>, vector<1x64xf32>
    %410 = vector.broadcast %409 : vector<1x64xf32> to vector<8x64xf32>
    %411 = arith.addf %408, %410 : vector<8x64xf32>
    %c64_144 = arith.constant 64 : index
    %c128_145 = arith.constant 128 : index
    %412 = vector.load %arg2[%c64_144, %c128_145] : memref<324x192xbf16, #tpu.memory_space<vmem>>, vector<64x20xbf16>
    %413 = arith.truncf %411 : vector<8x64xf32> to vector<8x64xbf16>
    %cst_146 = arith.constant dense<0.000000e+00> : vector<8x20xf32>
    %414 = tpu.matmul %413, %412, %cst_146 {dimension_numbers = #tpu.dot_dimension_numbers<[1], [0], [0], [1], [0, 0, 1, 1], [], []>} : vector<8x64xbf16>, vector<64x20xbf16>, vector<8x20xf32> -> vector<8x20xf32>
    %415 = arith.addf %403, %414 : vector<8x20xf32>
    %416 = vector.broadcast %389 : vector<8x1xf32> to vector<8x64xf32>
    %417 = arith.mulf %373, %416 : vector<8x64xf32>
    %c6_147 = arith.constant 6 : index
    %c128_148 = arith.constant 128 : index
    %418 = vector.load %arg3[%c6_147, %c128_148] : memref<11x192xf32, #tpu.memory_space<vmem>>, vector<1x64xf32>
    %419 = vector.broadcast %418 : vector<1x64xf32> to vector<8x64xf32>
    %420 = arith.mulf %417, %419 : vector<8x64xf32>
    %c7_149 = arith.constant 7 : index
    %c128_150 = arith.constant 128 : index
    %421 = vector.load %arg3[%c7_149, %c128_150] : memref<11x192xf32, #tpu.memory_space<vmem>>, vector<1x64xf32>
    %422 = vector.broadcast %421 : vector<1x64xf32> to vector<8x64xf32>
    %423 = arith.addf %420, %422 : vector<8x64xf32>
    %c128_151 = arith.constant 128 : index
    %c128_152 = arith.constant 128 : index
    %424 = vector.load %arg2[%c128_151, %c128_152] : memref<324x192xbf16, #tpu.memory_space<vmem>>, vector<64x20xbf16>
    %425 = arith.truncf %423 : vector<8x64xf32> to vector<8x64xbf16>
    %cst_153 = arith.constant dense<0.000000e+00> : vector<8x20xf32>
    %426 = tpu.matmul %425, %424, %cst_153 {dimension_numbers = #tpu.dot_dimension_numbers<[1], [0], [0], [1], [0, 0, 1, 1], [], []>} : vector<8x64xbf16>, vector<64x20xbf16>, vector<8x20xf32> -> vector<8x20xf32>
    %427 = arith.addf %415, %426 : vector<8x20xf32>
    %c304 = arith.constant 304 : index
    %c0_154 = arith.constant 0 : index
    %428 = vector.load %arg2[%c304, %c0_154] : memref<324x192xbf16, #tpu.memory_space<vmem>>, vector<20x2xbf16>
    %429 = arith.truncf %427 : vector<8x20xf32> to vector<8x20xbf16>
    %cst_155 = arith.constant dense<0.000000e+00> : vector<8x2xf32>
    %430 = tpu.matmul %429, %428, %cst_155 {dimension_numbers = #tpu.dot_dimension_numbers<[1], [0], [0], [1], [0, 0, 1, 1], [], []>} : vector<8x20xbf16>, vector<20x2xbf16>, vector<8x2xf32> -> vector<8x2xf32>
    %c9_156 = arith.constant 9 : index
    %c0_157 = arith.constant 0 : index
    %431 = vector.load %arg3[%c9_156, %c0_157] : memref<11x192xf32, #tpu.memory_space<vmem>>, vector<1x2xf32>
    %432 = vector.broadcast %431 : vector<1x2xf32> to vector<8x2xf32>
    %433 = arith.addf %430, %432 : vector<8x2xf32>
    %c0_158 = arith.constant 0 : index
    %c0_159 = arith.constant 0 : index
    %434 = vector.load %arg4[%c0_158, %c0_159] : memref<8x2xf32, #tpu.memory_space<vmem>>, vector<8x2xf32>
    tpu.vector_store %arg4[%c0_158, %c0_159], %433 {strides = array<i32>} : memref<8x2xf32, #tpu.memory_space<vmem>>, vector<8x2xf32>,
    return
  }
  func.func @transform_0(%arg0: i32) -> (i32, i32) {
    %c0_i32 = arith.constant 0 : i32
    %c0_i32_0 = arith.constant 0 : i32
    return %arg0, %c0_i32 : i32, i32
  }
  func.func @transform_1(%arg0: i32) -> (i32, i32) {
    %c0_i32 = arith.constant 0 : i32
    %c0_i32_0 = arith.constant 0 : i32
    %c0_i32_1 = arith.constant 0 : i32
    return %c0_i32, %c0_i32_0 : i32, i32
  }
  func.func @transform_2(%arg0: i32) -> (i32, i32) {
    %c0_i32 = arith.constant 0 : i32
    %c0_i32_0 = arith.constant 0 : i32
    %c0_i32_1 = arith.constant 0 : i32
    return %c0_i32, %c0_i32_0 : i32, i32
  }
  func.func @transform_3(%arg0: i32) -> (i32, i32) {
    %c0_i32 = arith.constant 0 : i32
    %c0_i32_0 = arith.constant 0 : i32
    return %arg0, %c0_i32 : i32, i32
  }
}

</mosaic_0001>

<bundles_post_ra>
// kernel: wbanet_forward.1
= control target key start
LH: loop header
LB: loop body
LE: loop exit
PB: predicated region body
PF: predicated region fallthrough
CT: control target
= control target key end

     0   :  { %s1464_s18 = smov 64   ;;  %vm116_vm0 = vcmask 523264   ;;  %v1465_v52 = vmov 19   ;;  %vm173_vm1 = vcmask 392192   ;;  %vm295_vm5 = vcmask 97280   ;;  %s1472_s16 = smov 126   ;;  %s2009_s0 = inlined_call_operand.vmem [shape: f32[8,192], index: 0, kind: input, shape index: {}]   ;;  %s2010_s1 = inlined_call_operand.vmem [shape: bf16[324,192], index: 1, kind: input, shape index: {}]   ;;  %s2011_s2 = inlined_call_operand.vmem [shape: f32[11,192], index: 2, kind: input, shape index: {}]   ;;  %s2012_s3 = inlined_call_operand.vmem [shape: f32[8,2], index: 3, kind: output, shape index: {}]  }
   0x1   :  { %v1533_v0 = vld [vmem:[%s2009_s0] sm:$0xff]  ;;  %v1168_v1 = vld [vmem:[%s2010_s1 + $0x70] sm:$0xf]  ;;  %v1313_v2 = vld [vmem:[%s2010_s1 + $0x74] sm:$0xf0]  ;;  %1393 = vset.pattern.permute.xlu0 %v1465_v52  ;;  %s1476_s17 = smov 127  }
   0x2   :  { %386 = vrot.lane.b32.xlu0 %v1533_v0, %s1464_s18  ;;  %v1169_v3 = vor.u32 %v1313_v2, %v1168_v1  ;;  %v1164_v4 = vld [vmem:[%s2010_s1 + $0x60] sm:$0xf]  ;;  %v1312_v5 = vld [vmem:[%s2010_s1 + $0x64] sm:$0xf0]  ;;  %v1184_v7 = vld [vmem:[%s2010_s1 + $0xb0] sm:$0xf]  ;;  %v41_v37 = vpack.c.bf16 %v1533_v0, %v1533_v0 }
   0x3   :  { %v1165_v6 = vor.u32 %v1312_v5, %v1164_v4  ;;  %v1160_v8 = vld [vmem:[%s2010_s1 + $0x50] sm:$0xf]  ;;  %v1311_v9 = vld [vmem:[%s2010_s1 + $0x54] sm:$0xf0]  ;;  %v1180_v12 = vld [vmem:[%s2010_s1 + $0xa0] sm:$0xf] }
   0x4   :  { %120 = vmatpush.bf16.msra.mxu0 %v1169_v3  ;;  %v1317_v10 = vld [vmem:[%s2010_s1 + $0xb4] sm:$0xf0]  ;;  %v1316_v13 = vld [vmem:[%s2010_s1 + $0xa4] sm:$0xf0]  ;;  %v1161_v14 = vor.u32 %v1311_v9, %v1160_v8  ;;  %v1156_v16 = vld [vmem:[%s2010_s1 + $0x40] sm:$0xf] }
   0x5   :  { %v1185_v11 = vor.u32 %v1317_v10, %v1184_v7  ;;  %v1181_v15 = vor.u32 %v1316_v13, %v1180_v12  ;;  %v1310_v17 = vld [vmem:[%s2010_s1 + $0x44] sm:$0xf0]  ;;  %v1152_v19 = vld [vmem:[%s2010_s1 + $0x30] sm:$0xf]  ;;  %v1309_v20 = vld [vmem:[%s2010_s1 + $0x34] sm:$0xf0] }
   0x6   :  { %v1157_v18 = vor.u32 %v1310_v17, %v1156_v16  ;;  %v1153_v21 = vor.u32 %v1309_v20, %v1152_v19  ;;  %v1148_v22 = vld [vmem:[%s2010_s1 + $0x20] sm:$0xf]  ;;  %v1308_v23 = vld [vmem:[%s2010_s1 + $0x24] sm:$0xf0]  ;;  %v1144_v25 = vld [vmem:[%s2010_s1 + $0x10] sm:$0xf] }
   0x7   :  { %137 = vmatpush.bf16.msra.mxu1 %v1185_v11  ;;  %v1149_v24 = vor.u32 %v1308_v23, %v1148_v22  ;;  %v1307_v26 = vld [vmem:[%s2010_s1 + $0x14] sm:$0xf0]  ;;  %v1176_v28 = vld [vmem:[%s2010_s1 + $0x90] sm:$0xf]  ;;  %v1140_v31 = vld [vmem:[%s2010_s1] sm:$0xf] }
   0x8   :  { %121 = vmatpush.bf16.msra.mxu0 %v1165_v6  ;;  %v1145_v27 = vor.u32 %v1307_v26, %v1144_v25  ;;  %v1315_v29 = vld [vmem:[%s2010_s1 + $0x94] sm:$0xf0]  ;;  %v1306_v32 = vld [vmem:[%s2010_s1 + $0x4] sm:$0xf0]  ;;  %v1172_v34 = vld [vmem:[%s2010_s1 + $0x80] sm:$0xf] }
   0x9   :  { %v1177_v30 = vor.u32 %v1315_v29, %v1176_v28  ;;  %v1141_v33 = vor.u32 %v1306_v32, %v1140_v31  ;;  %v1314_v35 = vld [vmem:[%s2010_s1 + $0x84] sm:$0xf0]  ;;  %v1197_v44 = vld [vmem:[%s2010_s1 + $0xe0] sm:$0xf]  ;;  %v1626_v47 = vld [vmem:[%s2011_s2 + $0x12] ss:$0 sm:$0xff] }
   0xa   :  { %v1173_v36 = vor.u32 %v1314_v35, %v1172_v34  ;;  %v16_v38 = vld [vmem:[%s2009_s0 + $0x8] sm:$0xff]  ;;  %v1193_v48 = vld [vmem:[%s2010_s1 + $0xd0] sm:$0xf]  ;;  %v1319_v49 = vld [vmem:[%s2010_s1 + $0xd4] sm:$0xf0]  ;;  %v1466_v13 = vmov 22  }
   0xb   :  { %138 = vmatpush.bf16.msra.mxu1 %v1181_v15  ;;  %v42_v39 = vpack.c.bf16 %v16_v38, %v16_v38  ;;  %v1320_v45 = vld [vmem:[%s2010_s1 + $0xe4] sm:$0xf0]  ;;  %v43_v50 = vld [vmem:[%s2011_s2] ss:$0 sm:$0xff]  ;;  %v1194_v51 = vor.u32 %v1319_v49, %v1193_v48  ;;  %v1210_v8 = vld [vmem:[%s2010_s1 + $0x110] sm:$0xf]  ;;  %1394 = vset.pattern.permute.xlu1 %v1466_v13 }
   0xc   :  { %122 = vmatpush.bf16.msra.mxu0 %v1161_v14  ;;  %v1198_v46 = vor.u32 %v1320_v45, %v1197_v44  ;;  %v1189_v53 = vld [vmem:[%s2010_s1 + $0xc0] sm:$0xf]  ;;  %v1318_v54 = vld [vmem:[%s2010_s1 + $0xc4] sm:$0xf0]  ;;  %v1324_v9 = vld [vmem:[%s2010_s1 + $0x114] sm:$0xf0] }
   0xd   :  { %v1190_v58 = vor.u32 %v1318_v54, %v1189_v53  ;;  %v1218_v4 = vld [vmem:[%s2010_s1 + $0x120] sm:$0xf]  ;;  %v1326_v5 = vld [vmem:[%s2010_s1 + $0x124] sm:$0xf0]  ;;  %v1211_v12 = vor.u32 %v1324_v9, %v1210_v8  ;;  %v1329_v25 = vld [vmem:[%s2010_s1 + $0xe8] sm:$0xf0] }
   0xe   :  { %182 = vmatpush.bf16.msra.mxu2 %v1198_v46  ;;  %v1219_v6 = vor.u32 %v1326_v5, %v1218_v4  ;;  %v154_v11 = vld [vmem:[%s2011_s2 + $0x1] ss:$0 sm:$0xff]  ;;  %v1322_v14 = vld [vmem:[%s2010_s1 + $0x104] sm:$0xf0]  ;;  %v1232_v31 = vld [vmem:[%s2010_s1 + $0xd4] sm:$0xf] }
   0xf   :  { %139 = vmatpush.bf16.msra.mxu1 %v1177_v30  ;;  %v1328_v32 = vld [vmem:[%s2010_s1 + $0xd8] sm:$0xf0]  ;;  %v1228_v35 = vld [vmem:[%s2010_s1 + $0xc4] sm:$0xf]  ;;  %v1204_v49 = vld [vmem:[%s2010_s1 + $0x108] sm:$0xf0] }
  0x10   :  { %123 = vmatpush.bf16.msra.mxu0 %v1157_v18  ;;  %236 = vmatpush.bf16.msra.mxu3 %v1219_v6  ;;  %v1233_v34 = vor.u32 %v1328_v32, %v1232_v31  ;;  %v1321_v48 = vld [vmem:[%s2010_s1 + $0x104] sm:$0xf]  ;;  %v1468_v53 = vmov 21   ;;  %s1477_s19 = smov 11   ;;  %s1479_s20 = smov 2   ;;  %vm343_vm7 = vcmask 1045504  }
  0x11   :  { %s1481_s21 = smov 5   ;;  %s1482_s22 = smov 8  }
  0x12   :  { %183 = vmatpush.bf16.msra.mxu2 %v1194_v51  ;;  %v1207_v51 = vor.u32 %v1321_v48, %v1204_v49  ;;  %s1483_s23 = smov 9   ;;  %v1330_v48 = vld [vmem:[%s2010_s1 + $0xf4] sm:$0xf]  ;;  %v1241_v49 = vld [vmem:[%s2010_s1 + $0xf0] sm:$0xf]  ;;  %s1484_s5 = smov 7  }
  0x13   :  { %140 = vmatpush.bf16.msra.mxu1 %v1173_v36  ;;  %v1327_v36 = vld [vmem:[%s2010_s1 + $0xc8] sm:$0xf0]  ;;  %s1491_s10 = smov 6   ;;  %s1494_s11 = smov 4  }
  0x14   :  { %124 = vmatpush.bf16.msra.mxu0 %v1153_v21  ;;  %237 = vmatpush.bf16.msra.mxu3 %v1211_v12 }
  0x16   :  { %1186 = vmatmul.msk.bf16.vlgmr.msra.gmra.mxu1 %vm116_vm0, %v42_v39  ;;  %184 = vmatpush.bf16.msra.mxu2 %v1190_v58  ;;  %v1323_v39 = vld [vmem:[%s2010_s1 + $0x114] sm:$0xf] }
  0x18   :  { %125 = vmatpush.bf16.msra.mxu0 %v1149_v24  ;;  %v1236_v24 = vld [vmem:[%s2010_s1 + $0xe4] sm:$0xf] }
  0x1c   :  { %126 = vmatpush.bf16.msra.mxu0 %v1145_v27  ;;  %v1237_v27 = vor.u32 %v1329_v25, %v1236_v24 }
  0x20   :  { %127 = vmatpush.bf16.msra.mxu0 %v1141_v33  ;;  %v1467_v33 = vmov 18  }
  0x21   :  { %1391 = vset.pattern.permute.xlu2 %v1467_v33 }
  0x22   :  { %439 = vperm.xlu2 %1391, %v1626_v47  }
  0x23   :  { %128 = vmatmul.bf16.vlgmr.msra.gmra.mxu0 %v41_v37  ;;  %v1325_v37 = vld [vmem:[%s2010_s1 + $0x124] sm:$0xf] }
  0x2a   :  { %1392 = vset.pattern.permute.xlu2 %v1468_v53 }
  0x2b   :  { %444 = vperm.xlu2 %1392, %v1626_v47  }
  0x74   :  { %v387_v40 = vpop.permute.xlu0 %386 }
  0x75   :  { %v389_v41 = vadd.f32 %v387_v40, %v1533_v0 }
  0x77   :  { %v390_v42 = vadd.f32 %v389_v41, %v16_v38  ;;  %v1229_v41 = vor.u32 %v1327_v36, %v1228_v35 }
  0x79   :  { %v391_v43 = vmul.f32 0.33333334, %v390_v42 }
  0x7b   :  { %394 = vrot.lane.b32.xlu0 %v391_v43, %s1464_s18  ;;  %v1658_v7 = vsub.f32 %v1533_v0, %v391_v43  ;;  %v1666_v10 = vsub.f32 %v16_v38, %v391_v43  ;;  %v1220_v38 = vld [vmem:[%s2010_s1 + $0x128] sm:$0xf0]  ;;  %v1212_v43 = vld [vmem:[%s2010_s1 + $0x118] sm:$0xf0] }
  0x7c   :  { %v1223_v42 = vor.u32 %v1325_v37, %v1220_v38  ;;  %v1215_v45 = vor.u32 %v1323_v39, %v1212_v43  ;;  %v440_v58 = vpop.permute.xlu2 %439  ;;  %v1474_v38 = vmov 14   ;;  %v1475_v39 = vmov 1  }
  0x7d   :  { %v399_v15 = vmul.f32 %v1658_v7, %v1658_v7  ;;  %v406_v21 = vmul.f32 %v1666_v10, %v1666_v10 }
  0x7e   :  { %249 = vmatpush.bf16.msrb.mxu2 %v1223_v42 }
  0x82   :  { %250 = vmatpush.bf16.msrb.mxu2 %v1215_v45  ;;  %v1480_v45 = vmov 8  }
  0x83   :  { %450 = vperm.xlu0 %1393, %v1626_v47  }
  0x86   :  { %251 = vmatpush.bf16.msrb.mxu2 %v1207_v51 }
  0x93   :  { %v142_v57 = vpop.f32.mrf.mxu1 }
  0x9b   :  { %v144_v63 = vpop.f32.mrf.mxu1 }
  0xa0   :  { %v129_v55 = vpop.f32.mrf.mxu0 }
  0xa1   :  { %v130_v56 = vadd.f32 %v129_v55, %v43_v50 }
  0xa3   :  { %v143_v59 = vadd.f32 %v142_v57, %v130_v56  ;;  %v1469_v56 = vmov 20   ;;  %v1470_v57 = vmov 17  }
  0xa4   :  { %1396 = vset.pattern.permute.xlu2 %v1469_v56 }
  0xa5   :  { %v146_v60 = vmax.f32 %v143_v59, 0.0  ;;  %429 = vperm.xlu2 %1396, %v1626_v47  }
  0xa7   :  { %v153_v61 = vpack.c.bf16 %v146_v60, %v146_v60 }
  0xa8   :  { %v131_v62 = vpop.f32.mrf.mxu0 }
  0xa9   :  { %1199 = vmatmul.msk.bf16.vlgmr.msra.gmra.mxu2 %vm173_vm1, %v153_v61  ;;  %v445_v62 = vpop.permute.xlu2 %444 }
  0xed   :  { %v395_v1 = vpop.permute.xlu0 %394 }
  0xee   :  { %v1646_v2 = vsub.f32 %v1533_v0, %v395_v1  ;;  %v1202_v0 = vld [vmem:[%s2010_s1 + $0x100] sm:$0xf] }
  0xef   :  { %v1203_v17 = vor.u32 %v1322_v14, %v1202_v0 }
  0xf0   :  { %v400_v3 = vmul.f32 %v1646_v2, %v1646_v2 }
  0xf1   :  { %238 = vmatpush.bf16.msra.mxu3 %v1203_v17 }
  0xf2   :  { %402 = vrot.lane.b32.xlu1 %v400_v3, %s1464_s18 }
  0xf5   :  { %287 = vmatpush.bf16.msrb.mxu3 %v1237_v27  ;;  %v451_v3 = vpop.permute.xlu0 %450 }
  0xf9   :  { %288 = vmatpush.bf16.msrb.mxu3 %v1233_v34 }
  0xfd   :  { %289 = vmatpush.bf16.msrb.mxu3 %v1229_v41 }
  0xff   :  { %v430_v17 = vpop.permute.xlu2 %429 }
 0x12c   :  { %v186_v16 = vpop.f32.mrf.mxu2 }
 0x12d   :  { %v187_v19 = vadd.f32 %v186_v16, %v154_v11 }
 0x12f   :  { %v190_v22 = vmax.f32 %v187_v19, 0.0 }
 0x131   :  { %v191_v26 = vpack.c.bf16 %v190_v22, %v190_v22 }
 0x133   :  { %1224 = vmatmul.msk.bf16.vlgmr.msra.gmra.mxu3 %vm173_vm1, %v191_v26  ;;  %1225 = vmatmul.msk.bf16.vlgmr.msrb.gmra.mxu2 %vm173_vm1, %v191_v26 }
 0x134   :  { %v188_v30 = vpop.f32.mrf.mxu2 }
 0x143   :  { %1238 = vmatmul.msk.bf16.vlgmr.msrb.gmra.mxu3 %vm173_vm1, %v191_v26  ;;  %v1473_v26 = vmov 12.0  }
 0x164   :  { %v403_v18 = vpop.permute.xlu1 %402 }
 0x165   :  { %v405_v20 = vadd.f32 %v403_v18, %v399_v15 }
 0x167   :  { %v407_v23 = vadd.f32 %v406_v21, %v405_v20  ;;  %v1471_v21 = vmov 15  }
 0x168   :  { %1397 = vset.pattern.permute.xlu0 %v1471_v21 }
 0x169   :  { %v408_v28 = vmul.f32 0.33333334, %v407_v23 }
 0x16b   :  { %v409_v29 = vadd.f32 1e-05, %v408_v28 }
 0x16d   :  { %1429 = vrsqrt.f32 %v409_v29  ;;  %vm416_vm3 = vweird.f32 %v409_v29 }
 0x16e   :  { %1431 = vrcp.f32 %v1473_v26 }
 0x173   :  { %v1430_v40 = vpop.eup %1429 }
 0x174   :  { %v411_v44 = vmul.f32 %v1430_v40, %v409_v29  ;;  %vm417_vm2 = vweird.f32 %v1430_v40  ;;  %v1432_v27 = vpop.eup %1431 }
 0x175   :  { %vm418_vm4 = vmor %vm416_vm3, %vm417_vm2  ;;  %v300_v28 = vmul.f32 12.0, %v1432_v27  ;;  %vm304_vm6 = vweird.f32 %v1432_v27 }
 0x176   :  { %v412_v46 = vmul.f32 %v1430_v40, %v411_v44  ;;  %v1478_v44 = vmov 16  }
 0x177   :  { %v301_v29 = vsub.f32 1.0, %v300_v28 }
 0x178   :  { %v413_v50 = vmul.f32 0.5, %v412_v46 }
 0x179   :  { %v302_v30 = vmul.f32 %v1432_v27, %v301_v29 }
 0x17a   :  { %v414_v52 = vsub.f32 1.5, %v413_v50  ;;  %v1243_v50 = vld [vmem:[%s2010_s1 + $0xf8] sm:$0x30] }
 0x17b   :  { %v303_v31 = vadd.f32 %v1432_v27, %v302_v30  ;;  %v1246_v53 = vor.u32 %v1330_v48, %v1243_v50  ;;  %v1490_v48 = vmov 11  }
 0x17c   :  { %v415_v54 = vmul.f32 %v1430_v40, %v414_v52  ;;  %v1331_v52 = vld [vmem:[%s2010_s1 + $0xf4] sm:$0x30] }
 0x17d   :  { %v305_v32 = vsel %vm304_vm6, %v1432_v27, %v303_v31 }
 0x17e   :  { %v419_v55 = vsel %vm418_vm4, %v1430_v40, %v415_v54  ;;  %v1242_v54 = vor.u32 %v1331_v52, %v1241_v49 }
 0x17f   :  { %434 = vrot.lane.b32.xlu1 %v419_v55, %s1464_s18  ;;  %v448_v63 = vmul.f32 %v419_v55, %v1666_v10  ;;  %v420_v14 = vmul.f32 %v419_v55, %v1658_v7  ;;  %v348_v55 = vsel %vm343_vm7, %v1246_v53, 0 }
 0x180   :  { %v345_v56 = vsel %vm343_vm7, %v1242_v54, 0  ;;  %370 = vmatpush.bf16.msra.mxu2 %v348_v55 }
 0x181   :  { %v453_v6 = vmul.f32 %v451_v3, %v448_v63  ;;  %357 = vmatpush.bf16.msrb.mxu1 %v345_v56 }
 0x187   :  { %455 = vperm.xlu1 %1394, %v1626_v47  }
 0x18f   :  { %1395 = vset.pattern.permute.xlu1 %v1470_v57 }
 0x190   :  { %424 = vperm.xlu1 %1395, %v1626_v47  }
 0x198   :  { %1398 = vset.pattern.permute.xlu1 %v1474_v38 }
 0x1b6   :  { %v1726_v59 = vpop.f32.mrf.mxu3  ;;  %v1744_v20 = vpop.f32.mrf.mxu2 }
 0x1be   :  { %v242_v4 = vpop.f32.mrf.mxu3  ;;  %v255_v22 = vpop.f32.mrf.mxu2 }
 0x1bf   :  { %v1487_v4 = vmov 25  }
 0x1c6   :  { %v291_v12 = vpop.f32.mrf.mxu3 }
 0x1ce   :  { %v293_v0 = vpop.f32.mrf.mxu3 }
 0x1f1   :  { %v435_v60 = vpop.permute.xlu1 %434 }
 0x1f2   :  { %v437_v61 = vmul.f32 %v435_v60, %v1646_v2  ;;  %v263_v2 = vld [vmem:[%s2011_s2 + $0x2] ss:$0 sm:$0xff]  ;;  %v1486_v60 = vmov 31  }
 0x1f3   :  { %v292_v10 = vadd.f32 %v291_v12, %v263_v2  ;;  %v325_v12 = vld [vmem:[%s2011_s2 + $0x3] ss:$0 sm:$0xff]  ;;  %v327_v2 = vld [vmem:[%s2011_s2 + $0x4] ss:$0 sm:$0xff] }
 0x1f4   :  { %v442_v1 = vmul.f32 %v440_v58, %v437_v61  ;;  %v1485_v58 = vmov 10  }
 0x1f5   :  { %v296_v15 = vsel %vm295_vm5, %v292_v10, 0.0  ;;  %1403 = vset.pattern.permute.xlu2 %v1485_v58 }
 0x1f6   :  { %v447_v5 = vadd.f32 %v445_v62, %v442_v1 }
 0x1f8   :  { %464 = vrot.lane.b32.xlu2 %v447_v5, %s1464_s18 }
 0x1f9   :  { %v456_v8 = vpop.permute.xlu1 %455 }
 0x1fa   :  { %v1731_v9 = vadd.f32 %v456_v8, %v453_v6 }
 0x1fc   :  { %v476_v11 = vsel %vm116_vm0, %v1731_v9, 0.0 }
 0x1fd   :  { %477 = vadd.xlane.f32.xlu1 %v476_v11 }
 0x202   :  { %v425_v13 = vpop.permute.xlu1 %424 }
 0x203   :  { %v427_v16 = vmul.f32 %v425_v13, %v420_v14 }
 0x205   :  { %v1740_v18 = vadd.f32 %v430_v17, %v427_v16  ;;  %v1489_v16 = vmov 30  }
 0x207   :  { %v459_v19 = vsel %vm116_vm0, %v1740_v18, 0.0 }
 0x221   :  { %297 = vadd.xlane.f32.xlu2 %v296_v15  ;;  %v1488_v15 = vmov 34  }
 0x229   :  { %460 = vadd.xlane.f32.xlu2 %v459_v19 }
 0x252   :  { %v465_v23 = vpop.permute.xlu2 %464 }
 0x253   :  { %v467_v24 = vsel %vm116_vm0, %v465_v23, 0.0 }
 0x254   :  { %468 = vadd.xlane.f32.xlu0 %v467_v24 }
 0x268   :  { %535 = vperm.xlu0 %1397, %v1626_v47  }
 0x270   :  { %v478_v7 = vpop.xlane.xlu1 %477  ;;  %1400 = vset.pattern.permute.xlu0 %v1475_v39 }
 0x271   :  { %v479_v25 = vmul.f32 %v478_v7, %v1626_v47 }
 0x273   :  { %481 = vrot.lane.b32.xlu2 %v479_v25, %s1472_s16 }
 0x294   :  { %v298_v33 = vpop.xlane.xlu2 %297 }
 0x295   :  { %v306_v34 = vmul.f32 %v305_v32, %v298_v33 }
 0x297   :  { %v1749_v35 = vsub.f32 %v292_v10, %v306_v34 }
 0x299   :  { %v308_v36 = vmul.f32 %v1749_v35, %v1749_v35 }
 0x29b   :  { %v309_v37 = vsel %vm295_vm5, %v308_v36, 0.0 }
 0x29c   :  { %310 = vadd.xlane.f32.xlu2 %v309_v37  ;;  %v461_v46 = vpop.xlane.xlu2 %460 }
 0x29d   :  { %v462_v19 = vmul.f32 %v461_v46, %v1626_v47 }
 0x2b4   :  { %611 = vperm.xlu2 %1403, %v1626_v47  }
 0x2bc   :  { %1404 = vset.pattern.permute.xlu2 %v1487_v4 }
 0x2bd   :  { %751 = vperm.xlu2 %1404, %v1626_v47  }
 0x2c5   :  { %1409 = vset.pattern.permute.xlu2 %v1488_v15  ;;  %v1492_v15 = vmov 37  }
 0x2c6   :  { %821 = vperm.xlu2 %1409, %v1626_v47  }
 0x2c7   :  { %v469_v40 = vpop.xlane.xlu0 %468 }
 0x2c8   :  { %v470_v41 = vmul.f32 %v469_v40, %v1626_v47 }
 0x2ca   :  { %472 = vrot.lane.b32.xlu1 %v470_v41, %s1476_s17 }
 0x2cd   :  { %v482_v51 = vpop.permute.xlu2 %481 }
 0x2ce   :  { %1412 = vset.pattern.permute.xlu2 %v1489_v16  ;;  %v1493_v16 = vmov 42  }
 0x2cf   :  { %789 = vperm.xlu2 %1412, %v1626_v47  }
 0x2d2   :  { %485 = vrot.lane.b32.xlu1 %v1626_v47, %s1477_s19 }
 0x2d7   :  { %1413 = vset.pattern.permute.xlu2 %v1493_v16 }
 0x2d8   :  { %746 = vperm.xlu2 %1413, %v1626_v47  }
 0x2da   :  { %v536_v42 = vpop.permute.xlu0 %535  ;;  %530 = vperm.xlu1 %1398, %v1626_v47  }
 0x2db   :  { %v538_v43 = vmul.f32 %v536_v42, %v447_v5 }
 0x2dd   :  { %540 = vrot.lane.b32.xlu0 %v538_v43, %s1464_s18 }
 0x2e0   :  { %1420 = vset.pattern.permute.xlu2 %v1490_v48 }
 0x2e2   :  { %1399 = vset.pattern.permute.xlu1 %v1478_v44 }
 0x2e3   :  { %545 = vperm.xlu1 %1399, %v1626_v47  }
 0x2e5   :  { %551 = vperm.xlu0 %1400, %v1626_v47  }
 0x2eb   :  { %600 = vrot.lane.b32.xlu1 %v1626_v47, %s1479_s20 }
 0x2ec   :  { %1401 = vset.pattern.permute.xlu1 %v1480_v45 }
 0x2ed   :  { %672 = vrot.lane.b32.xlu0 %v1626_v47, %s1481_s21 }
 0x2ee   :  { %1402 = vset.pattern.permute.xlu0 %v1490_v48 }
 0x2f3   :  { %668 = vrot.lane.b32.xlu1 %v1626_v47, %s1482_s22 }
 0x2fb   :  { %596 = vperm.xlu1 %1401, %v1626_v47  }
 0x303   :  { %634 = vrot.lane.b32.xlu1 %v1626_v47, %s1483_s23 }
 0x304   :  { %1405 = vset.pattern.permute.xlu1 %v1486_v60 }
 0x30b   :  { %706 = vrot.lane.b32.xlu1 %v1626_v47, %s1484_s5 }
 0x30f   :  { %v311_v57 = vpop.xlane.xlu2 %310 }
 0x310   :  { %v312_v61 = vmul.f32 %v311_v57, %v305_v32 }
 0x312   :  { %v313_v62 = vadd.f32 1e-05, %v312_v61 }
 0x313   :  { %799 = vperm.xlu1 %1405, %v1626_v47  }
 0x314   :  { %1433 = vrsqrt.f32 %v313_v62  ;;  %vm320_vm9 = vweird.f32 %v313_v62 }
 0x31a   :  { %v1434_v63 = vpop.eup %1433 }
 0x31b   :  { %v315_v1 = vmul.f32 %v1434_v63, %v313_v62  ;;  %vm321_vm8 = vweird.f32 %v1434_v63  ;;  %1407 = vset.pattern.permute.xlu1 %v1490_v48 }
 0x31c   :  { %vm322_vm10 = vmor %vm320_vm9, %vm321_vm8 }
 0x31d   :  { %v316_v3 = vmul.f32 %v1434_v63, %v315_v1 }
 0x31f   :  { %v317_v5 = vmul.f32 0.5, %v316_v3 }
 0x321   :  { %v318_v6 = vsub.f32 1.5, %v317_v5 }
 0x323   :  { %v319_v8 = vmul.f32 %v1434_v63, %v318_v6 }
 0x325   :  { %v323_v11 = vsel %vm322_vm10, %v1434_v63, %v319_v8 }
 0x326   :  { %v324_v0 = vmul.f32 %v323_v11, %v1749_v35 }
 0x328   :  { %v326_v10 = vmul.f32 %v325_v12, %v324_v0 }
 0x32a   :  { %v328_v13 = vadd.f32 %v327_v2, %v326_v10 }
 0x32c   :  { %v331_v14 = vpack.c.bf16 %v328_v13, %v328_v13 }
 0x32e   :  { %1247 = vmatmul.msk.bf16.vlgmr.msrb.gmra.mxu1 %vm295_vm5, %v331_v14  ;;  %1248 = vmatmul.msk.bf16.vlgmr.msra.gmra.mxu2 %vm295_vm5, %v331_v14 }
 0x33c   :  { %v473_v17 = vpop.permute.xlu1 %472 }
 0x33d   :  { %v475_v21 = vadd.f32 %v473_v17, %v462_v19 }
 0x33f   :  { %v484_v22 = vadd.f32 %v482_v51, %v475_v21 }
 0x344   :  { %v486_v23 = vpop.permute.xlu1 %485 }
 0x345   :  { %v488_v24 = vadd.f32 %v486_v23, %v484_v22 }
 0x347   :  { %v490_v7 = vmul.f32 0.70710677, %v488_v24  ;;  %v489_v4 = vmul.f32 0.5, %v488_v24 }
 0x349   :  { %v491_v25 = vand.u32 2147483647, %v490_v7  ;;  %vm524_vm15 = vcmp.ge.f32.partialorder %v490_v7, 0.0 }
 0x34b   :  { %v492_v26 = vmul.f32 0.3275911, %v491_v25  ;;  %v518_v46 = vsub.f32 0.0, %v491_v25 }
 0x34c   :  { %v531_v27 = vpop.permute.xlu1 %530 }
 0x34d   :  { %v493_v28 = vadd.f32 1.0, %v492_v26  ;;  %v533_v29 = vmul.f32 %v531_v27, %v1740_v18  ;;  %v519_v50 = vmul.f32 %v518_v46, %v491_v25 }
 0x34f   :  { %1435 = vrcp.f32 %v493_v28  ;;  %v541_v30 = vpop.permute.xlu0 %540  ;;  %v505_v39 = vand.u32 2147483648, %v493_v28  ;;  %v503_v41 = vand.u32 2147483647, %v493_v28  ;;  %vm499_vm12 = vweird.f32 %v493_v28 }
 0x350   :  { %v543_v31 = vadd.f32 %v541_v30, %v533_v29  ;;  %v520_v53 = vmul.f32 1.442695, %v519_v50 }
 0x351   :  { %v506_v18 = vor.u32 1.1754944e-38, %v505_v39  ;;  %vm504_vm14 = vcmp.eq.f32.partialorder %v503_v41, 8.507059e+37  ;;  %v1496_v39 = vmov 28   ;;  %v1497_v41 = vmov 36  }
 0x352   :  { %1437 = vpow2.f32 %v520_v53  ;;  %v1498_v53 = vmov 40  }
 0x355   :  { %v1436_v32 = vpop.eup %1435  ;;  %v546_v33 = vpop.permute.xlu1 %545 }
 0x356   :  { %v495_v34 = vmul.f32 %v1436_v32, %v493_v28  ;;  %v548_v35 = vmul.f32 %v546_v33, %v1731_v9  ;;  %vm500_vm11 = vweird.f32 %v1436_v32 }
 0x357   :  { %v552_v36 = vpop.permute.xlu0 %551  ;;  %vm501_vm13 = vmor %vm499_vm12, %vm500_vm11 }
 0x358   :  { %v496_v37 = vsub.f32 1.0, %v495_v34  ;;  %v549_v38 = vadd.f32 %v548_v35, %v543_v31  ;;  %v1438_v60 = vpop.eup %1437  ;;  %v1495_v35 = vmov 24  }
 0x35a   :  { %v497_v40 = vmul.f32 %v1436_v32, %v496_v37  ;;  %v1795_v42 = vadd.f32 %v552_v36, %v549_v38  ;;  %v1816_v37 = vpop.permute.xlu2 %611 }
 0x35c   :  { %v498_v43 = vadd.f32 %v1436_v32, %v497_v40  ;;  %v1804_v14 = vmul.f32 0.70710677, %v1795_v42  ;;  %v1249_v40 = vld [vmem:[%s2011_s2 + $0x5] ss:$8 sm:$0x3] }
 0x35d   :  { %v601_v62 = vpop.permute.xlu1 %600 }
 0x35e   :  { %v502_v44 = vsel %vm501_vm13, %v1436_v32, %v498_v43  ;;  %v1808_v17 = vand.u32 2147483647, %v1804_v14  ;;  %v379_v43 = vperm.slane %v1249_v40, 0  ;;  %vm590_vm9 = vcmp.ge.f32.partialorder %v1804_v14, 0.0 }
 0x35f   :  { %v507_v45 = vsel %vm504_vm14, %v506_v18, %v502_v44  ;;  %v673_v11 = vpop.permute.xlu0 %672 }
 0x360   :  { %v509_v9 = vmul.f32 1.0614054, %v507_v45  ;;  %v558_v22 = vmul.f32 0.3275911, %v1808_v17 }
 0x362   :  { %v510_v49 = vadd.f32 -1.4531521, %v509_v9  ;;  %v559_v23 = vadd.f32 1.0, %v558_v22 }
 0x364   :  { %v511_v51 = vmul.f32 %v510_v49, %v507_v45  ;;  %vm565_vm6 = vweird.f32 %v559_v23  ;;  %v569_v9 = vand.u32 2147483647, %v559_v23 }
 0x365   :  { %v669_v8 = vpop.permute.xlu1 %668 }
 0x366   :  { %v512_v52 = vadd.f32 1.4214138, %v511_v51  ;;  %v752_v51 = vpop.permute.xlu2 %751  ;;  %vm570_vm8 = vcmp.eq.f32.partialorder %v569_v9, 8.507059e+37 }
 0x368   :  { %v513_v54 = vmul.f32 %v512_v52, %v507_v45 }
 0x36a   :  { %v514_v55 = vadd.f32 -0.28449672, %v513_v54  ;;  %v380_v54 = vperm.slane %v1249_v40, 1 }
 0x36c   :  { %v515_v56 = vmul.f32 %v514_v55, %v507_v45 }
 0x36e   :  { %v516_v57 = vadd.f32 0.2548296, %v515_v56  ;;  %v1499_v56 = vmov 44  }
 0x370   :  { %v517_v58 = vmul.f32 %v516_v57, %v507_v45  ;;  %v571_v45 = vand.u32 2147483648, %v559_v23 }
 0x372   :  { %v522_v61 = vmul.f32 %v1438_v60, %v517_v58  ;;  %v572_v52 = vor.u32 1.1754944e-38, %v571_v45 }
 0x374   :  { %v523_v63 = vsub.f32 1.0, %v522_v61 }
 0x376   :  { %v525_v1 = vsub.f32 0.0, %v523_v63 }
 0x378   :  { %v526_v3 = vsel %vm524_vm15, %v523_v63, %v525_v1  ;;  %v1500_v1 = vmov 43  }
 0x379   :  { %v527_v5 = vadd.f32 1.0, %v526_v3 }
 0x37b   :  { %v1799_v6 = vmul.f32 %v527_v5, %v489_v4  ;;  %v1501_v4 = vmov 38  }
 0x37d   :  { %v603_v12 = vmul.f32 %v601_v62, %v1799_v6  ;;  %v671_v0 = vmul.f32 %v669_v8, %v1799_v6  ;;  %v1502_v8 = vmov 26  }
 0x37f   :  { %v675_v2 = vadd.f32 %v673_v11, %v671_v0  ;;  %606 = vperm.xlu0 %1402, %v603_v12   ;;  %v584_v12 = vsub.f32 0.0, %v1808_v17 }
 0x381   :  { %v676_v10 = vsub.f32 0.0, %v675_v2  ;;  %v585_v2 = vmul.f32 %v584_v12, %v1808_v17 }
 0x383   :  { %v677_v13 = vmul.f32 1.442695, %v676_v10 }
 0x385   :  { %1439 = vpow2.f32 %v677_v13  ;;  %v586_v13 = vmul.f32 1.442695, %v585_v2 }
 0x387   :  { %638 = vrot.lane.b32.xlu0 %v1626_v47, %s1491_s10 }
 0x388   :  { %1406 = vset.pattern.permute.xlu0 %v1492_v15 }
 0x38b   :  { %v1440_v19 = vpop.eup %1439 }
 0x38c   :  { %v679_v21 = vadd.f32 1.0, %v1440_v19 }
 0x38e   :  { %1441 = vrcp.f32 %v679_v21  ;;  %v691_v26 = vand.u32 2147483648, %v679_v21  ;;  %v689_v28 = vand.u32 2147483647, %v679_v21  ;;  %vm685_vm2 = vweird.f32 %v679_v21 }
 0x38f   :  { %710 = vrot.lane.b32.xlu0 %v1626_v47, %s1494_s11  ;;  %1443 = vrcp.f32 %v559_v23 }
 0x390   :  { %v692_v31 = vor.u32 1.1754944e-38, %v691_v26  ;;  %vm690_vm4 = vcmp.eq.f32.partialorder %v689_v28, 8.507059e+37  ;;  %1445 = vpow2.f32 %v586_v13  ;;  %v555_v26 = vmul.f32 0.5, %v1795_v42 }
 0x394   :  { %v1442_v24 = vpop.eup %1441 }
 0x395   :  { %v681_v7 = vmul.f32 %v1442_v24, %v679_v21  ;;  %vm686_vm1 = vweird.f32 %v1442_v24  ;;  %v1444_v30 = vpop.eup %1443 }
 0x396   :  { %vm687_vm3 = vmor %vm685_vm2, %vm686_vm1  ;;  %v561_v34 = vmul.f32 %v1444_v30, %v559_v23  ;;  %vm566_vm5 = vweird.f32 %v1444_v30  ;;  %v1446_v19 = vpop.eup %1445 }
 0x397   :  { %847 = vperm.xlu0 %1406, %v1626_v47   ;;  %v682_v25 = vsub.f32 1.0, %v681_v7  ;;  %vm567_vm7 = vmor %vm565_vm6, %vm566_vm5 }
 0x398   :  { %v562_v36 = vsub.f32 1.0, %v561_v34 }
 0x399   :  { %v683_v27 = vmul.f32 %v1442_v24, %v682_v25  ;;  %v597_v25 = vpop.permute.xlu1 %596 }
 0x39a   :  { %v563_v38 = vmul.f32 %v1444_v30, %v562_v36 }
 0x39b   :  { %v684_v29 = vadd.f32 %v1442_v24, %v683_v27 }
 0x39c   :  { %v564_v18 = vadd.f32 %v1444_v30, %v563_v38 }
 0x39d   :  { %v688_v32 = vsel %vm687_vm3, %v1442_v24, %v684_v29  ;;  %v1503_v29 = vmov 35  }
 0x39e   :  { %v693_v33 = vsel %vm690_vm4, %v692_v31, %v688_v32  ;;  %v568_v50 = vsel %vm567_vm7, %v1444_v30, %v564_v18  ;;  %vm1115_vm7 = vcmask 1041408  }
 0x39f   :  { %697 = vperm.xlu1 %1407, %v693_v33   ;;  %1411 = vset.pattern.permute.xlu0 %v1495_v35 }
 0x3a0   :  { %741 = vperm.xlu0 %1411, %v1626_v47  }
 0x3a1   :  { %v635_v30 = vpop.permute.xlu1 %634 }
 0x3a2   :  { %v637_v33 = vmul.f32 %v635_v30, %v1799_v6 }
 0x3a7   :  { %1408 = vset.pattern.permute.xlu1 %v1496_v39 }
 0x3a8   :  { %773 = vperm.xlu1 %1408, %v1626_v47   ;;  %1415 = vset.pattern.permute.xlu0 %v1497_v41 }
 0x3a9   :  { %837 = vperm.xlu0 %1415, %v1626_v47   ;;  %v707_v42 = vpop.permute.xlu1 %706 }
 0x3aa   :  { %v709_v40 = vmul.f32 %v707_v42, %v1799_v6 }
 0x3ab   :  { %v359_v44 = vpop.f32.mrf.mxu1 }
 0x3ac   :  { %v360_v46 = vadd.f32 %v359_v44, %v1726_v59  ;;  %v573_v59 = vsel %vm570_vm8, %v572_v52, %v568_v50 }
 0x3ad   :  { %v575_v62 = vmul.f32 1.0614054, %v573_v59 }
 0x3ae   :  { %v1824_v49 = vadd.f32 %v379_v43, %v360_v46 }
 0x3af   :  { %v576_v63 = vadd.f32 -1.4531521, %v575_v62 }
 0x3b0   :  { %1410 = vset.pattern.permute.xlu1 %v1498_v53  ;;  %v754_v55 = vmul.f32 %v752_v51, %v1824_v49 }
 0x3b1   :  { %869 = vperm.xlu1 %1410, %v1626_v47   ;;  %1419 = vset.pattern.permute.xlu0 %v1499_v56  ;;  %v372_v57 = vpop.f32.mrf.mxu2  ;;  %v577_v5 = vmul.f32 %v576_v63, %v573_v59  ;;  %v800_v9 = vpop.permute.xlu1 %799 }
 0x3b2   :  { %v373_v58 = vadd.f32 %v372_v57, %v1744_v20  ;;  %842 = vperm.xlu0 %1419, %v1626_v47   ;;  %756 = vrot.lane.b32.xlu2 %v754_v55, %s1464_s18 }
 0x3b3   :  { %v361_v60 = vpop.f32.mrf.mxu1  ;;  %v578_v20 = vadd.f32 1.4214138, %v577_v5 }
 0x3b4   :  { %v1831_v61 = vadd.f32 %v380_v54, %v373_v58 }
 0x3b5   :  { %v579_v11 = vmul.f32 %v578_v20, %v573_v59 }
 0x3b7   :  { %v580_v0 = vadd.f32 -0.28449672, %v579_v11 }
 0x3b9   :  { %1414 = vset.pattern.permute.xlu1 %v1500_v1  ;;  %v374_v3 = vpop.f32.mrf.mxu2  ;;  %v581_v10 = vmul.f32 %v580_v0, %v573_v59 }
 0x3ba   :  { %794 = vperm.xlu1 %1414, %v1626_v47   ;;  %1423 = vset.pattern.permute.xlu0 %v1501_v4 }
 0x3bb   :  { %857 = vperm.xlu0 %1423, %v1626_v47   ;;  %v582_v15 = vadd.f32 0.2548296, %v581_v10  ;;  %v822_v10 = vpop.permute.xlu2 %821 }
 0x3bd   :  { %v583_v16 = vmul.f32 %v582_v15, %v573_v59 }
 0x3bf   :  { %v588_v21 = vmul.f32 %v1446_v19, %v583_v16  ;;  %v802_v19 = vmul.f32 %v800_v9, %v1824_v49 }
 0x3c1   :  { %v589_v22 = vsub.f32 1.0, %v588_v21 }
 0x3c2   :  { %1416 = vset.pattern.permute.xlu1 %v1502_v8 }
 0x3c3   :  { %761 = vperm.xlu1 %1416, %v1626_v47   ;;  %v591_v23 = vsub.f32 0.0, %v589_v22  ;;  %1426 = vset.pattern.permute.xlu0 %v1503_v29 }
 0x3c4   :  { %831 = vperm.xlu0 %1426, %v1626_v47  }
 0x3c5   :  { %v592_v24 = vsel %vm590_vm9, %v589_v22, %v591_v23 }
 0x3c6   :  { %v593_v7 = vadd.f32 1.0, %v592_v24 }
 0x3c8   :  { %v594_v27 = vmul.f32 %v593_v7, %v555_v26 }
 0x3ca   :  { %v599_v17 = vmul.f32 %v597_v25, %v594_v27  ;;  %v1504_v25 = vmov 32   ;;  %v790_v27 = vpop.permute.xlu2 %789 }
 0x3cb   :  { %1417 = vset.pattern.permute.xlu1 %v1490_v48 }
 0x3d2   :  { %v747_v30 = vpop.permute.xlu2 %746 }
 0x3f1   :  { %v607_v28 = vpop.permute.xlu0 %606 }
 0x3f2   :  { %v609_v48 = vadd.f32 %v607_v28, %v599_v17  ;;  %v1461_v17 = vld [vmem:[%s2011_s2 + $0x12] ss:$0 sm:$0xff] }
 0x3f4   :  { %v614_v31 = vadd.f32 %v1816_v37, %v609_v48 }
 0x3f6   :  { %v615_v32 = vsub.f32 0.0, %v614_v31 }
 0x3f8   :  { %v616_v14 = vmul.f32 1.442695, %v615_v32  ;;  %v1505_v32 = vmov 27  }
 0x3f9   :  { %v639_v34 = vpop.permute.xlu0 %638 }
 0x3fa   :  { %1447 = vpow2.f32 %v616_v14  ;;  %v641_v35 = vadd.f32 %v639_v34, %v637_v33  ;;  %v1506_v34 = vmov 33  }
 0x3fc   :  { %v642_v36 = vsub.f32 0.0, %v641_v35 }
 0x3fe   :  { %v643_v38 = vmul.f32 1.442695, %v642_v36 }
 0x400   :  { %v1448_v39 = vpop.eup %1447  ;;  %1449 = vpow2.f32 %v643_v38 }
 0x401   :  { %v618_v41 = vadd.f32 1.0, %v1448_v39  ;;  %v711_v43 = vpop.permute.xlu0 %710 }
 0x402   :  { %v713_v18 = vadd.f32 %v711_v43, %v709_v40 }
 0x403   :  { %1451 = vrcp.f32 %v618_v41  ;;  %v630_v52 = vand.u32 2147483648, %v618_v41  ;;  %v628_v6 = vand.u32 2147483647, %v618_v41  ;;  %vm624_vm11 = vweird.f32 %v618_v41 }
 0x404   :  { %v714_v47 = vsub.f32 0.0, %v713_v18  ;;  %v1508_v18 = vmov 29  }
 0x405   :  { %v631_v58 = vor.u32 1.1754944e-38, %v630_v52  ;;  %vm629_vm13 = vcmp.eq.f32.partialorder %v628_v6, 8.507059e+37  ;;  %v792_v52 = vmul.f32 %v790_v27, %v1824_v49 }
 0x406   :  { %v1450_v37 = vpop.eup %1449  ;;  %v715_v44 = vmul.f32 1.442695, %v714_v47  ;;  %v1509_v47 = vmov 41  }
 0x407   :  { %v645_v45 = vadd.f32 1.0, %v1450_v37  ;;  %1428 = vset.pattern.permute.xlu0 %v1509_v47 }
 0x408   :  { %1453 = vpow2.f32 %v715_v44  ;;  %v1462_v44 = vld [vmem:[%s2009_s0] sm:$0xff] }
 0x409   :  { %v1452_v46 = vpop.eup %1451  ;;  %1455 = vrcp.f32 %v645_v45  ;;  %v657_v3 = vand.u32 2147483648, %v645_v45  ;;  %v655_v20 = vand.u32 2147483647, %v645_v45  ;;  %vm651_vm15 = vweird.f32 %v645_v45  ;;  %v848_v7 = vpop.permute.xlu0 %847 }
 0x40a   :  { %v620_v50 = vmul.f32 %v1452_v46, %v618_v41  ;;  %vm625_vm10 = vweird.f32 %v1452_v46  ;;  %v850_v35 = vmul.f32 %v848_v7, %v1824_v49  ;;  %v1507_v41 = vmov 39  }
 0x40b   :  { %vm626_vm12 = vmor %vm624_vm11, %vm625_vm10  ;;  %v658_v12 = vor.u32 1.1754944e-38, %v657_v3  ;;  %vm656_vm2 = vcmp.eq.f32.partialorder %v655_v20, 8.507059e+37  ;;  %vm1132_vm11 = vcmask 15360  }
 0x40c   :  { %v621_v51 = vsub.f32 1.0, %v620_v50  ;;  %v757_v42 = vpop.permute.xlu2 %756 }
 0x40e   :  { %v1454_v53 = vpop.eup %1453  ;;  %v622_v54 = vmul.f32 %v1452_v46, %v621_v51 }
 0x40f   :  { %v1456_v55 = vpop.eup %1455  ;;  %v717_v56 = vadd.f32 1.0, %v1454_v53 }
 0x410   :  { %v623_v57 = vadd.f32 %v1452_v46, %v622_v54  ;;  %v647_v59 = vmul.f32 %v1456_v55, %v645_v45  ;;  %vm652_vm14 = vweird.f32 %v1456_v55 }
 0x411   :  { %1457 = vrcp.f32 %v717_v56  ;;  %v698_v60 = vpop.permute.xlu1 %697  ;;  %vm653_vm1 = vmor %vm651_vm15, %vm652_vm14  ;;  %v729_v23 = vand.u32 2147483648, %v717_v56  ;;  %vm723_vm4 = vweird.f32 %v717_v56  ;;  %v727_v24 = vand.u32 2147483647, %v717_v56 }
 0x412   :  { %v627_v62 = vsel %vm626_vm12, %v1452_v46, %v623_v57  ;;  %v648_v63 = vsub.f32 1.0, %v647_v59  ;;  %v742_v31 = vpop.permute.xlu0 %741 }
 0x413   :  { %v1845_v1 = vsel %vm629_vm13, %v631_v58, %v627_v62  ;;  %v730_v48 = vor.u32 1.1754944e-38, %v729_v23  ;;  %vm728_vm6 = vcmp.eq.f32.partialorder %v727_v24, 8.507059e+37  ;;  %v744_v14 = vmul.f32 %v742_v31, %v1824_v49 }
 0x414   :  { %v700_v4 = vmul.f32 %v698_v60, %v1845_v1  ;;  %v649_v5 = vmul.f32 %v1456_v55, %v648_v63 }
 0x415   :  { %v749_v36 = vadd.f32 %v747_v30, %v744_v14 }
 0x416   :  { %702 = vrot.lane.b32.xlu2 %v700_v4, %s1464_s18  ;;  %v650_v8 = vadd.f32 %v1456_v55, %v649_v5 }
 0x417   :  { %v1458_v11 = vpop.eup %1457  ;;  %v759_v39 = vadd.f32 %v757_v42, %v749_v36 }
 0x418   :  { %v654_v0 = vsel %vm653_vm1, %v1456_v55, %v650_v8  ;;  %v719_v2 = vmul.f32 %v1458_v11, %v717_v56  ;;  %vm724_vm3 = vweird.f32 %v1458_v11 }
 0x419   :  { %v659_v13 = vsel %vm656_vm2, %v658_v12, %v654_v0  ;;  %vm725_vm5 = vmor %vm723_vm4, %vm724_vm3 }
 0x41a   :  { %663 = vperm.xlu1 %1417, %v659_v13   ;;  %v774_v15 = vpop.permute.xlu1 %773  ;;  %v720_v16 = vsub.f32 1.0, %v719_v2  ;;  %v1463_v2 = vld [vmem:[%s2009_s0 + $0x8] sm:$0xff] }
 0x41b   :  { %v838_v58 = vpop.permute.xlu0 %837 }
 0x41c   :  { %v721_v21 = vmul.f32 %v1458_v11, %v720_v16 }
 0x41e   :  { %804 = vrot.lane.b32.xlu2 %v802_v19, %s1464_s18  ;;  %v722_v22 = vadd.f32 %v1458_v11, %v721_v21  ;;  %v840_v21 = vmul.f32 %v838_v58, %v1824_v49  ;;  %v1343_v58 = vld [vmem:[%s2010_s1 + $0xb8] sm:$0xf0] }
 0x420   :  { %v726_v26 = vsel %vm725_vm5, %v1458_v11, %v722_v22 }
 0x421   :  { %v731_v29 = vsel %vm728_vm6, %v730_v48, %v726_v26 }
 0x422   :  { %1418 = vset.pattern.permute.xlu1 %v1504_v25 }
 0x423   :  { %809 = vperm.xlu1 %1418, %v1461_v17   ;;  %v870_v28 = vpop.permute.xlu1 %869 }
 0x424   :  { %v843_v63 = vpop.permute.xlu0 %842 }
 0x425   :  { %v845_v23 = vadd.f32 %v843_v63, %v840_v21  ;;  %v1260_v63 = vld [vmem:[%s2010_s1 + $0x24] sm:$0xf]  ;;  %v1341_v21 = vld [vmem:[%s2010_s1 + $0x98] sm:$0xf0] }
 0x426   :  { %735 = vperm.xlu2 %1420, %v731_v29  }
 0x42b   :  { %1421 = vset.pattern.permute.xlu1 %v1505_v32 }
 0x42c   :  { %v795_v33 = vpop.permute.xlu1 %794  ;;  %767 = vperm.xlu1 %1421, %v1461_v17  }
 0x42d   :  { %v797_v54 = vadd.f32 %v795_v33, %v792_v52  ;;  %v858_v12 = vpop.permute.xlu0 %857 }
 0x42e   :  { %1422 = vset.pattern.permute.xlu2 %v1506_v34 }
 0x42f   :  { %815 = vperm.xlu2 %1422, %v1461_v17  }
 0x434   :  { %852 = vrot.lane.b32.xlu1 %v850_v35, %s1464_s18 }
 0x435   :  { %v762_v38 = vpop.permute.xlu1 %761  ;;  %1427 = vset.pattern.permute.xlu1 %v1509_v47 }
 0x436   :  { %v764_v40 = vmul.f32 %v762_v38, %v1831_v61 }
 0x437   :  { %1424 = vset.pattern.permute.xlu2 %v1507_v41 }
 0x438   :  { %v765_v43 = vadd.f32 %v764_v40, %v759_v39  ;;  %863 = vperm.xlu2 %1424, %v1461_v17  }
 0x440   :  { %1425 = vset.pattern.permute.xlu2 %v1508_v18 }
 0x441   :  { %783 = vperm.xlu2 %1425, %v1461_v17  }
 0x470   :  { %v703_v37 = vpop.permute.xlu2 %702 }
 0x471   :  { %v705_v45 = vmul.f32 %v1462_v44, %v703_v37 }
 0x473   :  { %v872_v46 = vmul.f32 %v870_v28, %v705_v45  ;;  %v776_v9 = vmul.f32 %v774_v15, %v705_v45  ;;  %v824_v50 = vmul.f32 %v822_v10, %v705_v45 }
 0x475   :  { %874 = vrot.lane.b32.xlu2 %v872_v46, %s1464_s18  ;;  %778 = vrot.lane.b32.xlu1 %v776_v9, %s1464_s18 }
 0x478   :  { %v805_v53 = vpop.permute.xlu2 %804 }
 0x479   :  { %v807_v55 = vadd.f32 %v805_v53, %v797_v54  ;;  %v1901_v53 = vld [vmem:[%s2011_s2 + $0x7] ss:$0 sm:$0xff]  ;;  %v1264_v54 = vld [vmem:[%s2010_s1 + $0x34] sm:$0xf] }
 0x47d   :  { %826 = vrot.lane.b32.xlu1 %v824_v50, %s1464_s18 }
 0x480   :  { %v736_v59 = vpop.permute.xlu2 %735 }
 0x481   :  { %v738_v8 = vmul.f32 %v736_v59, %v1845_v1  ;;  %v1298_v59 = vld [vmem:[%s2010_s1 + $0xb4] sm:$0xf] }
 0x483   :  { %v739_v10 = vmul.f32 %v1463_v2, %v738_v8  ;;  %v1294_v8 = vld [vmem:[%s2010_s1 + $0xa4] sm:$0xf]  ;;  %v1256_v2 = vld [vmem:[%s2010_s1 + $0x14] sm:$0xf] }
 0x485   :  { %879 = vperm.xlu1 %1427, %v1461_v17   ;;  %v860_v17 = vmul.f32 %v858_v12, %v1831_v61 }
 0x489   :  { %v816_v60 = vpop.permute.xlu2 %815 }
 0x48c   :  { %v664_v51 = vpop.permute.xlu1 %663 }
 0x48d   :  { %v666_v4 = vmul.f32 %v664_v51, %v1845_v1  ;;  %v832_v1 = vpop.permute.xlu0 %831 }
 0x48e   :  { %v834_v28 = vmul.f32 %v832_v1, %v739_v10  ;;  %v1252_v1 = vld [vmem:[%s2010_s1 + $0x4] sm:$0xf] }
 0x48f   :  { %v667_v20 = vmul.f32 %v1462_v44, %v666_v4  ;;  %v1277_v4 = vld [vmem:[%s2010_s1 + $0x64] sm:$0xf] }
 0x491   :  { %v818_v7 = vmul.f32 %v816_v60, %v667_v20 }
 0x492   :  { %v864_v3 = vpop.permute.xlu2 %863 }
 0x493   :  { %v866_v31 = vmul.f32 %v864_v3, %v667_v20  ;;  %v1334_v3 = vld [vmem:[%s2010_s1 + $0x28] sm:$0xf0] }
 0x495   :  { %v810_v6 = vpop.permute.xlu1 %809 }
 0x496   :  { %v812_v56 = vmul.f32 %v810_v6, %v1831_v61  ;;  %v1879_v61 = vld [vmem:[%s2011_s2 + $0x6] ss:$0 sm:$0xff]  ;;  %v1335_v6 = vld [vmem:[%s2010_s1 + $0x38] sm:$0xf0] }
 0x498   :  { %v813_v57 = vadd.f32 %v812_v56, %v807_v55  ;;  %v1281_v55 = vld [vmem:[%s2010_s1 + $0x74] sm:$0xf]  ;;  %v1265_v56 = vor.u32 %v1335_v6, %v1264_v54  ;;  %v1045_v54 = vld [vmem:[%s2011_s2 + $0xf] ss:$0 sm:$0xff] }
 0x49a   :  { %v819_v26 = vadd.f32 %v818_v7, %v813_v57  ;;  %v1339_v57 = vld [vmem:[%s2010_s1 + $0x78] sm:$0xf0]  ;;  %971 = vmatpush.bf16.msra.mxu3 %v1265_v56 }
 0x49b   :  { %v784_v0 = vpop.permute.xlu2 %783  ;;  %v1282_v60 = vor.u32 %v1339_v57, %v1281_v55 }
 0x49c   :  { %v786_v16 = vmul.f32 %v784_v0, %v739_v10 }
 0x49d   :  { %1032 = vmatpush.bf16.msrb.mxu0 %v1282_v60 }
 0x49e   :  { %v768_v62 = vpop.permute.xlu1 %767 }
 0x49f   :  { %v770_v11 = vmul.f32 %v768_v62, %v667_v20  ;;  %v1299_v62 = vor.u32 %v1343_v58, %v1298_v59  ;;  %v1338_v20 = vld [vmem:[%s2010_s1 + $0x68] sm:$0xf0] }
 0x4a0   :  { %v1278_v12 = vor.u32 %v1338_v20, %v1277_v4  ;;  %v925_v4 = vld [vmem:[%s2011_s2 + $0x10] ss:$0 sm:$0xff] }
 0x4a1   :  { %v771_v13 = vadd.f32 %v770_v11, %v765_v43  ;;  %1087 = vmatpush.bf16.msra.mxu1 %v1299_v62  ;;  %v1342_v11 = vld [vmem:[%s2010_s1 + $0xa8] sm:$0xf0] }
 0x4a2   :  { %v1295_v0 = vor.u32 %v1342_v11, %v1294_v8  ;;  %1033 = vmatpush.bf16.msrb.mxu0 %v1278_v12 }
 0x4a5   :  { %1088 = vmatpush.bf16.msra.mxu1 %v1295_v0 }
 0x4a6   :  { %v853_v5 = vpop.permute.xlu1 %852 }
 0x4a7   :  { %v855_v25 = vadd.f32 %v853_v5, %v845_v23  ;;  %v1261_v5 = vor.u32 %v1334_v3, %v1260_v63 }
 0x4a9   :  { %v861_v29 = vadd.f32 %v860_v17, %v855_v25  ;;  %972 = vmatpush.bf16.msra.mxu3 %v1261_v5  ;;  %v1332_v25 = vld [vmem:[%s2010_s1 + $0x8] sm:$0xf0] }
 0x4aa   :  { %v1336_v17 = vld [vmem:[%s2010_s1 + $0x48] sm:$0xf0] }
 0x4ab   :  { %v867_v33 = vadd.f32 %v866_v31, %v861_v29 }
 0x4cf   :  { %v875_v49 = vpop.permute.xlu2 %874 }
 0x4d0   :  { %v877_v34 = vadd.f32 %v875_v49, %v867_v33  ;;  %v1099_v33 = vld [vmem:[%s2010_s1 + $0x140] sm:$0x3] }
 0x4e7   :  { %v779_v15 = vpop.permute.xlu1 %778 }
 0x4e8   :  { %v781_v19 = vadd.f32 %v779_v15, %v771_v13  ;;  %v1273_v13 = vld [vmem:[%s2010_s1 + $0x54] sm:$0xf] }
 0x4ea   :  { %v787_v22 = vadd.f32 %v786_v16, %v781_v19  ;;  %v1337_v16 = vld [vmem:[%s2010_s1 + $0x58] sm:$0xf0]  ;;  %v1290_v19 = vld [vmem:[%s2010_s1 + $0x94] sm:$0xf] }
 0x4eb   :  { %v1274_v23 = vor.u32 %v1337_v16, %v1273_v13  ;;  %v1101_v13 = vld [vmem:[%s2011_s2 + $0x11] ss:$0 sm:$0xff] }
 0x4ec   :  { %v884_v24 = vsel %vm116_vm0, %v787_v22, 0.0 }
 0x4ed   :  { %885 = vadd.xlane.f32.xlu2 %v884_v24  ;;  %v1291_v24 = vor.u32 %v1341_v21, %v1290_v19  ;;  %1034 = vmatpush.bf16.msrb.mxu0 %v1274_v23 }
 0x4ef   :  { %v827_v27 = vpop.permute.xlu1 %826  ;;  %1089 = vmatpush.bf16.msra.mxu1 %v1291_v24 }
 0x4f0   :  { %v829_v48 = vadd.f32 %v827_v27, %v819_v26  ;;  %v1269_v26 = vld [vmem:[%s2010_s1 + $0x44] sm:$0xf]  ;;  %v1253_v27 = vor.u32 %v1332_v25, %v1252_v1 }
 0x4f1   :  { %v1270_v29 = vor.u32 %v1336_v17, %v1269_v26 }
 0x4f2   :  { %v835_v30 = vadd.f32 %v834_v28, %v829_v48  ;;  %v1286_v28 = vld [vmem:[%s2010_s1 + $0x84] sm:$0xf]  ;;  %v1340_v48 = vld [vmem:[%s2010_s1 + $0x88] sm:$0xf0] }
 0x4f3   :  { %1035 = vmatpush.bf16.msrb.mxu0 %v1270_v29 }
 0x4f4   :  { %v887_v32 = vsel %vm116_vm0, %v835_v30, 0.0 }
 0x4f5   :  { %888 = vadd.xlane.f32.xlu1 %v887_v32 }
 0x4f7   :  { %v880_v14 = vpop.permute.xlu1 %879 }
 0x4f8   :  { %v882_v35 = vmul.f32 %v880_v14, %v739_v10  ;;  %v1333_v10 = vld [vmem:[%s2010_s1 + $0x18] sm:$0xf0] }
 0x4f9   :  { %v1257_v15 = vor.u32 %v1333_v10, %v1256_v2 }
 0x4fa   :  { %v883_v36 = vadd.f32 %v882_v35, %v877_v34  ;;  %v1107_v34 = vunpack.c.l.b16 %v1099_v33 }
 0x4fb   :  { %973 = vmatpush.bf16.msra.mxu3 %v1257_v15 }
 0x4fc   :  { %v891_v42 = vsel %vm116_vm0, %v883_v36, 0.0 }
 0x4fd   :  { %892 = vadd.xlane.f32.xlu0 %v891_v42 }
 0x4ff   :  { %974 = vmatpush.bf16.msra.mxu3 %v1253_v27 }
 0x511   :  { %983 = vrot.lane.b32.xlu0 %v1879_v61, %s1464_s18 }
 0x560   :  { %v886_v39 = vpop.xlane.xlu2 %885 }
 0x568   :  { %v889_v38 = vpop.xlane.xlu1 %888 }
 0x569   :  { %v890_v40 = vadd.f32 %v889_v38, %v886_v39 }
 0x570   :  { %v893_v41 = vpop.xlane.xlu0 %892 }
 0x571   :  { %v894_v43 = vadd.f32 %v893_v41, %v890_v40 }
 0x573   :  { %v895_v18 = vmul.f32 0.0052083335, %v894_v43 }
 0x575   :  { %v1883_v47 = vsub.f32 %v835_v30, %v895_v18  ;;  %v1885_v37 = vsub.f32 %v787_v22, %v895_v18  ;;  %v1893_v50 = vsub.f32 %v883_v36, %v895_v18  ;;  %v1287_v30 = vor.u32 %v1340_v48, %v1286_v28 }
 0x576   :  { %v1109_v36 = vpack.c.b16 %v1107_v34, %v1107_v34 }
 0x577   :  { %v903_v44 = vmul.f32 %v1883_v47, %v1883_v47  ;;  %v899_v45 = vmul.f32 %v1885_v37, %v1885_v37  ;;  %v908_v51 = vmul.f32 %v1893_v50, %v1893_v50  ;;  %1090 = vmatpush.bf16.msra.mxu1 %v1287_v30 }
 0x578   :  { %v1117_v42 = vsel %vm1115_vm7, %v1109_v36, 0 }
 0x579   :  { %v904_v46 = vsel %vm116_vm0, %v903_v44, 0.0  ;;  %v900_v9 = vsel %vm116_vm0, %v899_v45, 0.0  ;;  %v909_v52 = vsel %vm116_vm0, %v908_v51, 0.0  ;;  %1125 = vmatpush.bf16.msrb.mxu2 %v1117_v42  ;;  %v1043_v44 = vld [vmem:[%s2011_s2 + $0xe] ss:$0 sm:$0xff] }
 0x57a   :  { %905 = vadd.xlane.f32.xlu1 %v904_v46  ;;  %901 = vadd.xlane.f32.xlu2 %v900_v9 }
 0x582   :  { %910 = vadd.xlane.f32.xlu2 %v909_v52 }
 0x583   :  { %v984_v45 = vpop.permute.xlu0 %983 }
 0x593   :  { %988 = vrot.lane.b32.xlu1 %v1901_v53, %s1464_s18 }
 0x5ed   :  { %v902_v22 = vpop.xlane.xlu2 %901  ;;  %v906_v7 = vpop.xlane.xlu1 %905 }
 0x5ee   :  { %v907_v31 = vadd.f32 %v906_v7, %v902_v22 }
 0x5f5   :  { %v911_v32 = vpop.xlane.xlu2 %910 }
 0x5f6   :  { %v912_v49 = vadd.f32 %v911_v32, %v907_v31 }
 0x5f8   :  { %v913_v14 = vmul.f32 0.0052083335, %v912_v49 }
 0x5fa   :  { %v914_v35 = vadd.f32 1e-05, %v913_v14 }
 0x5fc   :  { %1459 = vrsqrt.f32 %v914_v35  ;;  %vm921_vm9 = vweird.f32 %v914_v35 }
 0x602   :  { %v1460_v38 = vpop.eup %1459 }
 0x603   :  { %v916_v39 = vmul.f32 %v1460_v38, %v914_v35  ;;  %vm922_vm8 = vweird.f32 %v1460_v38 }
 0x604   :  { %vm923_vm10 = vmor %vm921_vm9, %vm922_vm8 }
 0x605   :  { %v917_v40 = vmul.f32 %v1460_v38, %v916_v39  ;;  %v989_v6 = vpop.permute.xlu1 %988 }
 0x607   :  { %v918_v41 = vmul.f32 0.5, %v917_v40 }
 0x609   :  { %v919_v43 = vsub.f32 1.5, %v918_v41 }
 0x60b   :  { %v920_v18 = vmul.f32 %v1460_v38, %v919_v43 }
 0x60d   :  { %v924_v46 = vsel %vm923_vm10, %v1460_v38, %v920_v18 }
 0x60e   :  { %v926_v9 = vmul.f32 %v924_v46, %v1885_v37  ;;  %v981_v51 = vmul.f32 %v924_v46, %v1883_v47  ;;  %v1042_v52 = vmul.f32 %v924_v46, %v1893_v50  ;;  %v1303_v47 = vld [vmem:[%s2010_s1 + $0x130] sm:$0xf] }
 0x610   :  { %v928_v55 = vmul.f32 %v1879_v61, %v926_v9  ;;  %v986_v56 = vmul.f32 %v984_v45, %v981_v51  ;;  %v1044_v57 = vmul.f32 %v1043_v44, %v1042_v52  ;;  %v1344_v61 = vld [vmem:[%s2010_s1 + $0x134] sm:$0xf0] }
 0x611   :  { %v1304_v50 = vor.u32 %v1344_v61, %v1303_v47 }
 0x612   :  { %v930_v59 = vadd.f32 %v1901_v53, %v928_v55  ;;  %v1046_v58 = vadd.f32 %v1045_v54, %v1044_v57  ;;  %v991_v60 = vadd.f32 %v989_v6, %v986_v56 }
 0x613   :  { %1126 = vmatpush.bf16.msrb.mxu2 %v1304_v50 }
 0x614   :  { %v939_v62 = vpack.c.bf16 %v930_v59, %v930_v59  ;;  %v1055_v63 = vpack.c.bf16 %v1046_v58, %v1046_v58  ;;  %v1000_v37 = vpack.c.bf16 %v991_v60, %v991_v60 }
 0x616   :  { %1266 = vmatmul.msk.bf16.vlgmr.msra.gmra.mxu3 %vm116_vm0, %v939_v62  ;;  %1283 = vmatmul.msk.bf16.vlgmr.msrb.gmra.mxu0 %vm116_vm0, %v1000_v37 }
 0x617   :  { %1300 = vmatmul.msk.bf16.vlgmr.msra.gmra.mxu1 %vm116_vm0, %v1055_v63  ;;  %vm1111_vm0 = vcmask 162816  }
 0x693   :  { %v1037_v53 = vpop.f32.mrf.mxu0 }
 0x694   :  { %v1092_v3 = vpop.f32.mrf.mxu1 }
 0x699   :  { %v976_v5 = vpop.f32.mrf.mxu3 }
 0x69a   :  { %v980_v20 = vadd.f32 %v976_v5, %v925_v4 }
 0x69b   :  { %v1039_v8 = vpop.f32.mrf.mxu0 }
 0x69c   :  { %v1041_v11 = vadd.f32 %v1037_v53, %v980_v20  ;;  %v1094_v12 = vpop.f32.mrf.mxu1 }
 0x69e   :  { %v1096_v0 = vadd.f32 %v1092_v3, %v1041_v11 }
 0x6a0   :  { %v1100_v2 = vpack.c.bf16 %v1096_v0, %v1096_v0 }
 0x6a1   :  { %v978_v10 = vpop.f32.mrf.mxu3 }
 0x6a2   :  { %1305 = vmatmul.msk.bf16.vlgmr.msrb.gmra.mxu2 %vm1111_vm0, %v1100_v2 }
 0x725   :  { %v1128_v15 = vpop.f32.mrf.mxu2 }
 0x726   :  { %v1129_v16 = vadd.f32 %v1128_v15, %v1101_v13 }
 0x728   :  { %1133 = vst.msk [vmem:[%s2012_s3] sm:$0xff] %vm1132_vm11, %v1129_v16 }
 0x72d   :  { %v1130_v19 = vpop.f32.mrf.mxu2 }

</bundles_post_ra>
